<compile_context>
chip_gen: v6e
topology: v6e:2x2x1
jax: 0.10.0
libtpu: 0.0.40
codegen_flags: <defaults>
</compile_context>

<pallas_src>
import functools

import jax
import jax.numpy as jnp
from jax.experimental import pallas as pl
from jax.experimental.pallas import tpu as pltpu

_EPS = 1e-5

# Column layout of the packed per-channel vector slab (C, 8).
_COL_BOUT, _COL_BN2G, _COL_BN2B = 0, 1, 2          # length-C entries
_COL_BPW, _COL_BN1G, _COL_BN1B, _COL_BSE2 = 3, 4, 5, 6   # length-mid entries
_COL_BSE1 = 7                                       # length-mid4 entries
_N_VEC_COLS = 8


# -----------------------------------------------------------------------------
# Fused kernel: depthwise 3x3 + pw 1x1 + BN1 + ReLU + SE + out 1x1 + BN2 +
#               residual + ReLU, exact batch BN stats computed in-kernel.
# -----------------------------------------------------------------------------
def _conv_expert_kernel(x_ref, planes_ref, wpw_ref, wse1_ref, wse2_ref,
                        wout_ref, vecs_ref, o_ref, *, B, C, H, W, mid, mid4):
    HW = H * W
    inv_cnt = 1.0 / float(B * HW)

    vecs = vecs_ref[...]                             # (C, 8) packed vectors
    bpw = vecs[:mid, _COL_BPW:_COL_BPW + 1]          # pw bias (dw bias folded)
    g1 = vecs[:mid, _COL_BN1G:_COL_BN1G + 1]
    be1 = vecs[:mid, _COL_BN1B:_COL_BN1B + 1]
    bse2 = vecs[:mid, _COL_BSE2:_COL_BSE2 + 1]
    bse1 = vecs[:mid4, _COL_BSE1:_COL_BSE1 + 1]
    bout = vecs[:, _COL_BOUT:_COL_BOUT + 1]
    g2 = vecs[:, _COL_BN2G:_COL_BN2G + 1]
    be2 = vecs[:, _COL_BN2B:_COL_BN2B + 1]

    wpw = wpw_ref[...]                               # (mid, C)
    wse1 = wse1_ref[...]                             # (mid4, mid)
    wse2 = wse2_ref[...]                             # (mid, mid4)
    wout = wout_ref[...]                             # (C, mid)

    # ---- depthwise 3x3 (8 rolls, pre-masked weight planes -> 1 FMA per tap)
    #      + pointwise 1x1 (C -> mid) ----------------------------------------
    ys = []
    for b in range(B):                               # B static: unrolled
        x = x_ref[b]                                 # (C, HW) lane-dense
        acc = x * planes_ref[4]                      # centre tap (mask == 1)
        k = 0
        for dh in (-1, 0, 1):
            for dw in (-1, 0, 1):
                if dh == 0 and dw == 0:
                    k += 1
                    continue
                off = dh * W + dw
                # want shifted[p] = x[p + off] (roll semantics: out[i]=x[i-s])
                shifted = pltpu.roll(x, shift=(-off) % HW, axis=1)
                acc = acc + shifted * planes_ref[k]  # boundary mask baked in
                k += 1
        y = jnp.dot(wpw, acc, preferred_element_type=jnp.float32) + bpw
        ys.append(y)                                 # (mid, HW)

    # ---- BN1: exact whole-batch training stats, two-pass (in-kernel) -------
    mean1 = sum(jnp.sum(y, axis=1, keepdims=True) for y in ys) * inv_cnt
    var1 = sum(jnp.sum((y - mean1) * (y - mean1), axis=1, keepdims=True)
               for y in ys) * inv_cnt
    a1 = g1 * jax.lax.rsqrt(var1 + _EPS)
    c1 = be1 - mean1 * a1
    ys = [jnp.maximum(y * a1 + c1, 0.0) for y in ys]

    # ---- Squeeze-Excite: per-image pooling, batched tiny matmuls -----------
    pooled = jnp.concatenate(
        [jnp.mean(y, axis=1, keepdims=True) for y in ys], axis=1)   # (mid, B)
    s = jnp.maximum(
        jnp.dot(wse1, pooled, preferred_element_type=jnp.float32) + bse1,
        0.0)                                                         # (mid4, B)
    s = jax.nn.sigmoid(
        jnp.dot(wse2, s, preferred_element_type=jnp.float32) + bse2)  # (mid, B)

    # ---- out 1x1 (mid -> C) --------------------------------------------------
    zs = []
    for b in range(B):
        z = jnp.dot(wout, ys[b] * s[:, b:b + 1],
                    preferred_element_type=jnp.float32) + bout
        zs.append(z)                                 # (C, HW)

    # ---- BN2 (two-pass batch stats) + residual + ReLU -----------------------
    mean2 = sum(jnp.sum(z, axis=1, keepdims=True) for z in zs) * inv_cnt
    var2 = sum(jnp.sum((z - mean2) * (z - mean2), axis=1, keepdims=True)
               for z in zs) * inv_cnt
    a2 = g2 * jax.lax.rsqrt(var2 + _EPS)
    c2 = be2 - mean2 * a2
    for b in range(B):
        o_ref[b] = jnp.maximum(zs[b] * a2 + c2 + x_ref[b], 0.0)


# -----------------------------------------------------------------------------
# Wrapper
# -----------------------------------------------------------------------------
def _padded_vmem_bytes(shape, itemsize=4):
    """Padded VMEM footprint of one buffer: last two dims rounded to (8,128)."""
    if len(shape) == 1:
        rows, cols, lead = 1, shape[0], 1
    else:
        rows, cols = shape[-2], shape[-1]
        lead = 1
        for d in shape[:-2]:
            lead *= d
    r = ((rows + 7) // 8) * 8
    c = ((cols + 127) // 128) * 128
    return lead * r * c * itemsize


def conv_expert_forward(x_nchw, p):
    """Pallas implementation of ConvExpert.forward. Input/output are NCHW."""
    x4 = x_nchw.astype(jnp.float32)
    B, C, H, W = x4.shape
    HW = H * W
    mid = C // 2
    mid4 = mid // 4
    x = x4.reshape(B, C, HW)                 # free reshape, keeps NCHW order

    # Pre-masked depthwise weight planes (9, C, HW): mask(tap) * w[c, tap].
    wdw9 = p["dw_w"].reshape(C, 9).astype(jnp.float32)
    hh = jnp.arange(HW, dtype=jnp.int32) // W
    ww = jnp.arange(HW, dtype=jnp.int32) % W
    planes = []
    k = 0
    for dh in (-1, 0, 1):
        for dw in (-1, 0, 1):
            m = jnp.ones((HW,), jnp.float32)
            if dh == -1:
                m = m * (hh >= 1).astype(jnp.float32)
            elif dh == 1:
                m = m * (hh <= H - 2).astype(jnp.float32)
            if dw == -1:
                m = m * (ww >= 1).astype(jnp.float32)
            elif dw == 1:
                m = m * (ww <= W - 2).astype(jnp.float32)
            planes.append(wdw9[:, k][:, None] * m[None, :])
            k += 1
    planes = jnp.stack(planes, axis=0)       # (9, C, HW)

    wpw = p["pw_w"].reshape(mid, C).astype(jnp.float32)
    # Fold depthwise bias into the pointwise bias: pw(dw(x)+b) = pw(dw(x)) + (Wpw@b + bpw)
    bdw = p["dw_b"].reshape(C, 1).astype(jnp.float32)
    bpw_f = wpw @ bdw + p["pw_b"].reshape(mid, 1).astype(jnp.float32)
    wse1 = p["se1_w"].reshape(mid4, mid).astype(jnp.float32)
    wse2 = p["se2_w"].reshape(mid, mid4).astype(jnp.float32)
    wout = p["out_w"].reshape(C, mid).astype(jnp.float32)

    def col(v):
        v = jnp.asarray(v, jnp.float32).reshape(-1, 1)
        return jnp.pad(v, ((0, C - v.shape[0]), (0, 0)))

    # One packed (C, 8) slab instead of 8 separately padded tiny inputs.
    vecs = jnp.concatenate(
        [col(p["out_b"]), col(p["bn2_g"]), col(p["bn2_b"]),
         col(bpw_f), col(p["bn1_g"]), col(p["bn1_b"]),
         col(p["se2_b"]), col(p["se1_b"])], axis=1)           # (C, 8)

    inputs = (x, planes, wpw, wse1, wse2, wout, vecs)
    out_shape = jax.ShapeDtypeStruct((B, C, HW), jnp.float32)

    # VMEM budget, sized for v7x (64 MiB physical / 32 MiB scoped): every
    # input/output at padded footprint, x2 for double-buffering, + 1 MiB slack.
    total = sum(_padded_vmem_bytes(a.shape) for a in inputs)
    total += _padded_vmem_bytes(out_shape.shape)
    assert 2 * total + (1 << 20) < 24 * 1024 * 1024, (
        "batch does not fit VMEM for the fused kernel; fall back to a "
        "gridded multi-pass variant (per-image BN partial sums)")

    def full_spec(shape):
        nd = len(shape)
        return pl.BlockSpec(shape, lambda i, _nd=nd: (0,) * _nd)

    out = pl.pallas_call(
        functools.partial(_conv_expert_kernel,
                          B=B, C=C, H=H, W=W, mid=mid, mid4=mid4),
        grid=(1,),
        in_specs=[full_spec(a.shape) for a in inputs],
        out_specs=full_spec((B, C, HW)),
        out_shape=out_shape,
        compiler_params=pltpu.CompilerParams(
            dimension_semantics=("arbitrary",),
            vmem_limit_bytes=32 * 1024 * 1024),
    )(*inputs)

    return out.reshape(B, C, H, W)           # free reshape back to NCHW


# -----------------------------------------------------------------------------
# Pure-JAX NCHW reference mirroring the PyTorch module (training-mode BN)
# -----------------------------------------------------------------------------
def ref_forward(x, p):
    C = x.shape[1]
    dw = jax.lax.conv_general_dilated(
        x, p["dw_w"], (1, 1), [(1, 1), (1, 1)],
        feature_group_count=C,
        dimension_numbers=("NCHW", "OIHW", "NCHW")) + p["dw_b"][None, :, None, None]
    y = jnp.einsum("nchw,mc->nmhw", dw, p["pw_w"][:, :, 0, 0]) + p["pw_b"][None, :, None, None]
    mu = y.mean(axis=(0, 2, 3), keepdims=True)
    var = ((y - mu) ** 2).mean(axis=(0, 2, 3), keepdims=True)
    y = (y - mu) * jax.lax.rsqrt(var + _EPS) * p["bn1_g"][None, :, None, None] + p["bn1_b"][None, :, None, None]
    y = jnp.maximum(y, 0.0)
    pooled = y.mean(axis=(2, 3))                                    # (N, mid)
    s = jnp.maximum(pooled @ p["se1_w"][:, :, 0, 0].T + p["se1_b"], 0.0)
    s = jax.nn.sigmoid(s @ p["se2_w"][:, :, 0, 0].T + p["se2_b"])
    y = y * s[:, :, None, None]
    z = jnp.einsum("nmhw,cm->nchw", y, p["out_w"][:, :, 0, 0]) + p["out_b"][None, :, None, None]
    mu2 = z.mean(axis=(0, 2, 3), keepdims=True)
    var2 = ((z - mu2) ** 2).mean(axis=(0, 2, 3), keepdims=True)
    z = (z - mu2) * jax.lax.rsqrt(var2 + _EPS) * p["bn2_g"][None, :, None, None] + p["bn2_b"][None, :, None, None]
    return jnp.maximum(z + x, 0.0)


if __name__ == "__main__":
    B, C, H, W = 2, 16, 16, 16
    mid, mid4 = C // 2, (C // 2) // 4

    key = jax.random.PRNGKey(0)
    ks = jax.random.split(key, 16)
    p = {
        "dw_w": 0.20 * jax.random.normal(ks[0], (C, 1, 3, 3), jnp.float32),
        "dw_b": 0.05 * jax.random.normal(ks[1], (C,), jnp.float32),
        "pw_w": 0.20 * jax.random.normal(ks[2], (mid, C, 1, 1), jnp.float32),
        "pw_b": 0.05 * jax.random.normal(ks[3], (mid,), jnp.float32),
        "bn1_g": 1.0 + 0.10 * jax.random.normal(ks[4], (mid,), jnp.float32),
        "bn1_b": 0.05 * jax.random.normal(ks[5], (mid,), jnp.float32),
        "se1_w": 0.20 * jax.random.normal(ks[6], (mid4, mid, 1, 1), jnp.float32),
        "se1_b": 0.05 * jax.random.normal(ks[7], (mid4,), jnp.float32),
        "se2_w": 0.20 * jax.random.normal(ks[8], (mid, mid4, 1, 1), jnp.float32),
        "se2_b": 0.05 * jax.random.normal(ks[9], (mid,), jnp.float32),
        "out_w": 0.20 * jax.random.normal(ks[10], (C, mid, 1, 1), jnp.float32),
        "out_b": 0.05 * jax.random.normal(ks[11], (C,), jnp.float32),
        "bn2_g": 1.0 + 0.10 * jax.random.normal(ks[12], (C,), jnp.float32),
        "bn2_b": 0.05 * jax.random.normal(ks[13], (C,), jnp.float32),
    }

    x_nchw = jax.random.normal(ks[15], (B, C, H, W), jnp.float32)

    out = conv_expert_forward(x_nchw, p)
    out = jax.block_until_ready(out)

    ref = ref_forward(x_nchw, p)
    assert out.shape == (B, C, H, W)
    if not bool(jnp.allclose(out, ref, rtol=1e-3, atol=1e-3)):
        raise AssertionError("Pallas ConvExpert output mismatch vs JAX reference")

    print("KERNEL_OK")
</pallas_src>

<mosaic_0001>
module attributes {stable_mosaic.version = 11 : i64} {
  func.func @_conv_expert_kernel(%arg0: i32, %arg1: memref<2x16x256xf32, #tpu.memory_space<vmem>>, %arg2: memref<9x16x256xf32, #tpu.memory_space<vmem>>, %arg3: memref<8x16xf32, #tpu.memory_space<vmem>>, %arg4: memref<2x8xf32, #tpu.memory_space<vmem>>, %arg5: memref<8x2xf32, #tpu.memory_space<vmem>>, %arg6: memref<16x8xf32, #tpu.memory_space<vmem>>, %arg7: memref<16x8xf32, #tpu.memory_space<vmem>>, %arg8: memref<2x16x256xf32, #tpu.memory_space<vmem>>) attributes {dimension_semantics = [#tpu.dimension_semantics<arbitrary>], iteration_bounds = array<i64: 1>, scalar_prefetch = 0 : i64, scratch_operands = 0 : i64, tpu.core_type = #tpu.core_type<tc>, window_params = [{pipeline_mode = #tpu.pipeline_mode<synchronous>, transform_indices = @transform_0, window_bounds = array<i64: 2, 16, 256>}, {pipeline_mode = #tpu.pipeline_mode<synchronous>, transform_indices = @transform_1, window_bounds = array<i64: 9, 16, 256>}, {pipeline_mode = #tpu.pipeline_mode<synchronous>, transform_indices = @transform_2, window_bounds = array<i64: 8, 16>}, {pipeline_mode = #tpu.pipeline_mode<synchronous>, transform_indices = @transform_3, window_bounds = array<i64: 2, 8>}, {pipeline_mode = #tpu.pipeline_mode<synchronous>, transform_indices = @transform_4, window_bounds = array<i64: 8, 2>}, {pipeline_mode = #tpu.pipeline_mode<synchronous>, transform_indices = @transform_5, window_bounds = array<i64: 16, 8>}, {pipeline_mode = #tpu.pipeline_mode<synchronous>, transform_indices = @transform_6, window_bounds = array<i64: 16, 8>}, {pipeline_mode = #tpu.pipeline_mode<synchronous>, transform_indices = @transform_7, window_bounds = array<i64: 2, 16, 256>}]} {
    %c0 = arith.constant 0 : index
    %c0_0 = arith.constant 0 : index
    %0 = vector.load %arg7[%c0, %c0_0] : memref<16x8xf32, #tpu.memory_space<vmem>>, vector<16x8xf32>
    %1 = vector.extract_strided_slice %0 {offsets = [0, 3], sizes = [8, 1], strides = [1, 1]} : vector<16x8xf32> to vector<8x1xf32>
    %2 = vector.extract_strided_slice %0 {offsets = [0, 4], sizes = [8, 1], strides = [1, 1]} : vector<16x8xf32> to vector<8x1xf32>
    %3 = vector.extract_strided_slice %0 {offsets = [0, 5], sizes = [8, 1], strides = [1, 1]} : vector<16x8xf32> to vector<8x1xf32>
    %4 = vector.extract_strided_slice %0 {offsets = [0, 6], sizes = [8, 1], strides = [1, 1]} : vector<16x8xf32> to vector<8x1xf32>
    %5 = vector.extract_strided_slice %0 {offsets = [0, 7], sizes = [2, 1], strides = [1, 1]} : vector<16x8xf32> to vector<2x1xf32>
    %6 = vector.extract_strided_slice %0 {offsets = [0, 0], sizes = [16, 1], strides = [1, 1]} : vector<16x8xf32> to vector<16x1xf32>
    %7 = vector.extract_strided_slice %0 {offsets = [0, 1], sizes = [16, 1], strides = [1, 1]} : vector<16x8xf32> to vector<16x1xf32>
    %8 = vector.extract_strided_slice %0 {offsets = [0, 2], sizes = [16, 1], strides = [1, 1]} : vector<16x8xf32> to vector<16x1xf32>
    %c0_1 = arith.constant 0 : index
    %c0_2 = arith.constant 0 : index
    %9 = vector.load %arg3[%c0_1, %c0_2] : memref<8x16xf32, #tpu.memory_space<vmem>>, vector<8x16xf32>
    %c0_3 = arith.constant 0 : index
    %c0_4 = arith.constant 0 : index
    %10 = vector.load %arg4[%c0_3, %c0_4] : memref<2x8xf32, #tpu.memory_space<vmem>>, vector<2x8xf32>
    %c0_5 = arith.constant 0 : index
    %c0_6 = arith.constant 0 : index
    %11 = vector.load %arg5[%c0_5, %c0_6] : memref<8x2xf32, #tpu.memory_space<vmem>>, vector<8x2xf32>
    %c0_7 = arith.constant 0 : index
    %c0_8 = arith.constant 0 : index
    %12 = vector.load %arg6[%c0_7, %c0_8] : memref<16x8xf32, #tpu.memory_space<vmem>>, vector<16x8xf32>
    %c0_9 = arith.constant 0 : index
    %c0_10 = arith.constant 0 : index
    %c0_11 = arith.constant 0 : index
    %13 = vector.load %arg1[%c0_9, %c0_10, %c0_11] : memref<2x16x256xf32, #tpu.memory_space<vmem>>, vector<1x16x256xf32>
    %14 = vector.shape_cast %13 : vector<1x16x256xf32> to vector<16x256xf32>
    %c4 = arith.constant 4 : index
    %c0_12 = arith.constant 0 : index
    %c0_13 = arith.constant 0 : index
    %15 = vector.load %arg2[%c4, %c0_12, %c0_13] : memref<9x16x256xf32, #tpu.memory_space<vmem>>, vector<1x16x256xf32>
    %16 = vector.shape_cast %15 : vector<1x16x256xf32> to vector<16x256xf32>
    %17 = arith.mulf %14, %16 : vector<16x256xf32>
    %c17_i32 = arith.constant 17 : i32
    %18 = tpu.dynamic_rotate %14 by %c17_i32 dim 1 : vector<16x256xf32>, i32 -> vector<16x256xf32>
    %c0_14 = arith.constant 0 : index
    %c0_15 = arith.constant 0 : index
    %c0_16 = arith.constant 0 : index
    %19 = vector.load %arg2[%c0_14, %c0_15, %c0_16] : memref<9x16x256xf32, #tpu.memory_space<vmem>>, vector<1x16x256xf32>
    %20 = vector.shape_cast %19 : vector<1x16x256xf32> to vector<16x256xf32>
    %21 = arith.mulf %18, %20 : vector<16x256xf32>
    %22 = arith.addf %17, %21 : vector<16x256xf32>
    %c16_i32 = arith.constant 16 : i32
    %23 = tpu.dynamic_rotate %14 by %c16_i32 dim 1 : vector<16x256xf32>, i32 -> vector<16x256xf32>
    %c1 = arith.constant 1 : index
    %c0_17 = arith.constant 0 : index
    %c0_18 = arith.constant 0 : index
    %24 = vector.load %arg2[%c1, %c0_17, %c0_18] : memref<9x16x256xf32, #tpu.memory_space<vmem>>, vector<1x16x256xf32>
    %25 = vector.shape_cast %24 : vector<1x16x256xf32> to vector<16x256xf32>
    %26 = arith.mulf %23, %25 : vector<16x256xf32>
    %27 = arith.addf %22, %26 : vector<16x256xf32>
    %c15_i32 = arith.constant 15 : i32
    %28 = tpu.dynamic_rotate %14 by %c15_i32 dim 1 : vector<16x256xf32>, i32 -> vector<16x256xf32>
    %c2 = arith.constant 2 : index
    %c0_19 = arith.constant 0 : index
    %c0_20 = arith.constant 0 : index
    %29 = vector.load %arg2[%c2, %c0_19, %c0_20] : memref<9x16x256xf32, #tpu.memory_space<vmem>>, vector<1x16x256xf32>
    %30 = vector.shape_cast %29 : vector<1x16x256xf32> to vector<16x256xf32>
    %31 = arith.mulf %28, %30 : vector<16x256xf32>
    %32 = arith.addf %27, %31 : vector<16x256xf32>
    %c1_i32 = arith.constant 1 : i32
    %33 = tpu.dynamic_rotate %14 by %c1_i32 dim 1 : vector<16x256xf32>, i32 -> vector<16x256xf32>
    %c3 = arith.constant 3 : index
    %c0_21 = arith.constant 0 : index
    %c0_22 = arith.constant 0 : index
    %34 = vector.load %arg2[%c3, %c0_21, %c0_22] : memref<9x16x256xf32, #tpu.memory_space<vmem>>, vector<1x16x256xf32>
    %35 = vector.shape_cast %34 : vector<1x16x256xf32> to vector<16x256xf32>
    %36 = arith.mulf %33, %35 : vector<16x256xf32>
    %37 = arith.addf %32, %36 : vector<16x256xf32>
    %c255_i32 = arith.constant 255 : i32
    %38 = tpu.dynamic_rotate %14 by %c255_i32 dim 1 : vector<16x256xf32>, i32 -> vector<16x256xf32>
    %c5 = arith.constant 5 : index
    %c0_23 = arith.constant 0 : index
    %c0_24 = arith.constant 0 : index
    %39 = vector.load %arg2[%c5, %c0_23, %c0_24] : memref<9x16x256xf32, #tpu.memory_space<vmem>>, vector<1x16x256xf32>
    %40 = vector.shape_cast %39 : vector<1x16x256xf32> to vector<16x256xf32>
    %41 = arith.mulf %38, %40 : vector<16x256xf32>
    %42 = arith.addf %37, %41 : vector<16x256xf32>
    %c241_i32 = arith.constant 241 : i32
    %43 = tpu.dynamic_rotate %14 by %c241_i32 dim 1 : vector<16x256xf32>, i32 -> vector<16x256xf32>
    %c6 = arith.constant 6 : index
    %c0_25 = arith.constant 0 : index
    %c0_26 = arith.constant 0 : index
    %44 = vector.load %arg2[%c6, %c0_25, %c0_26] : memref<9x16x256xf32, #tpu.memory_space<vmem>>, vector<1x16x256xf32>
    %45 = vector.shape_cast %44 : vector<1x16x256xf32> to vector<16x256xf32>
    %46 = arith.mulf %43, %45 : vector<16x256xf32>
    %47 = arith.addf %42, %46 : vector<16x256xf32>
    %c240_i32 = arith.constant 240 : i32
    %48 = tpu.dynamic_rotate %14 by %c240_i32 dim 1 : vector<16x256xf32>, i32 -> vector<16x256xf32>
    %c7 = arith.constant 7 : index
    %c0_27 = arith.constant 0 : index
    %c0_28 = arith.constant 0 : index
    %49 = vector.load %arg2[%c7, %c0_27, %c0_28] : memref<9x16x256xf32, #tpu.memory_space<vmem>>, vector<1x16x256xf32>
    %50 = vector.shape_cast %49 : vector<1x16x256xf32> to vector<16x256xf32>
    %51 = arith.mulf %48, %50 : vector<16x256xf32>
    %52 = arith.addf %47, %51 : vector<16x256xf32>
    %c239_i32 = arith.constant 239 : i32
    %53 = tpu.dynamic_rotate %14 by %c239_i32 dim 1 : vector<16x256xf32>, i32 -> vector<16x256xf32>
    %c8 = arith.constant 8 : index
    %c0_29 = arith.constant 0 : index
    %c0_30 = arith.constant 0 : index
    %54 = vector.load %arg2[%c8, %c0_29, %c0_30] : memref<9x16x256xf32, #tpu.memory_space<vmem>>, vector<1x16x256xf32>
    %55 = vector.shape_cast %54 : vector<1x16x256xf32> to vector<16x256xf32>
    %56 = arith.mulf %53, %55 : vector<16x256xf32>
    %57 = arith.addf %52, %56 : vector<16x256xf32>
    %cst = arith.constant dense<0.000000e+00> : vector<8x256xf32>
    %58 = tpu.matmul %9, %57, %cst {dimension_numbers = #tpu.dot_dimension_numbers<[1], [0], [0], [1], [0, 0, 1, 1], [], []>} : vector<8x16xf32>, vector<16x256xf32>, vector<8x256xf32> -> vector<8x256xf32>
    %59 = vector.broadcast %1 : vector<8x1xf32> to vector<8x256xf32>
    %60 = arith.addf %58, %59 : vector<8x256xf32>
    %c1_31 = arith.constant 1 : index
    %c0_32 = arith.constant 0 : index
    %c0_33 = arith.constant 0 : index
    %61 = vector.load %arg1[%c1_31, %c0_32, %c0_33] : memref<2x16x256xf32, #tpu.memory_space<vmem>>, vector<1x16x256xf32>
    %62 = vector.shape_cast %61 : vector<1x16x256xf32> to vector<16x256xf32>
    %c4_34 = arith.constant 4 : index
    %c0_35 = arith.constant 0 : index
    %c0_36 = arith.constant 0 : index
    %63 = vector.load %arg2[%c4_34, %c0_35, %c0_36] : memref<9x16x256xf32, #tpu.memory_space<vmem>>, vector<1x16x256xf32>
    %64 = vector.shape_cast %63 : vector<1x16x256xf32> to vector<16x256xf32>
    %65 = arith.mulf %62, %64 : vector<16x256xf32>
    %c17_i32_37 = arith.constant 17 : i32
    %66 = tpu.dynamic_rotate %62 by %c17_i32_37 dim 1 : vector<16x256xf32>, i32 -> vector<16x256xf32>
    %c0_38 = arith.constant 0 : index
    %c0_39 = arith.constant 0 : index
    %c0_40 = arith.constant 0 : index
    %67 = vector.load %arg2[%c0_38, %c0_39, %c0_40] : memref<9x16x256xf32, #tpu.memory_space<vmem>>, vector<1x16x256xf32>
    %68 = vector.shape_cast %67 : vector<1x16x256xf32> to vector<16x256xf32>
    %69 = arith.mulf %66, %68 : vector<16x256xf32>
    %70 = arith.addf %65, %69 : vector<16x256xf32>
    %c16_i32_41 = arith.constant 16 : i32
    %71 = tpu.dynamic_rotate %62 by %c16_i32_41 dim 1 : vector<16x256xf32>, i32 -> vector<16x256xf32>
    %c1_42 = arith.constant 1 : index
    %c0_43 = arith.constant 0 : index
    %c0_44 = arith.constant 0 : index
    %72 = vector.load %arg2[%c1_42, %c0_43, %c0_44] : memref<9x16x256xf32, #tpu.memory_space<vmem>>, vector<1x16x256xf32>
    %73 = vector.shape_cast %72 : vector<1x16x256xf32> to vector<16x256xf32>
    %74 = arith.mulf %71, %73 : vector<16x256xf32>
    %75 = arith.addf %70, %74 : vector<16x256xf32>
    %c15_i32_45 = arith.constant 15 : i32
    %76 = tpu.dynamic_rotate %62 by %c15_i32_45 dim 1 : vector<16x256xf32>, i32 -> vector<16x256xf32>
    %c2_46 = arith.constant 2 : index
    %c0_47 = arith.constant 0 : index
    %c0_48 = arith.constant 0 : index
    %77 = vector.load %arg2[%c2_46, %c0_47, %c0_48] : memref<9x16x256xf32, #tpu.memory_space<vmem>>, vector<1x16x256xf32>
    %78 = vector.shape_cast %77 : vector<1x16x256xf32> to vector<16x256xf32>
    %79 = arith.mulf %76, %78 : vector<16x256xf32>
    %80 = arith.addf %75, %79 : vector<16x256xf32>
    %c1_i32_49 = arith.constant 1 : i32
    %81 = tpu.dynamic_rotate %62 by %c1_i32_49 dim 1 : vector<16x256xf32>, i32 -> vector<16x256xf32>
    %c3_50 = arith.constant 3 : index
    %c0_51 = arith.constant 0 : index
    %c0_52 = arith.constant 0 : index
    %82 = vector.load %arg2[%c3_50, %c0_51, %c0_52] : memref<9x16x256xf32, #tpu.memory_space<vmem>>, vector<1x16x256xf32>
    %83 = vector.shape_cast %82 : vector<1x16x256xf32> to vector<16x256xf32>
    %84 = arith.mulf %81, %83 : vector<16x256xf32>
    %85 = arith.addf %80, %84 : vector<16x256xf32>
    %c255_i32_53 = arith.constant 255 : i32
    %86 = tpu.dynamic_rotate %62 by %c255_i32_53 dim 1 : vector<16x256xf32>, i32 -> vector<16x256xf32>
    %c5_54 = arith.constant 5 : index
    %c0_55 = arith.constant 0 : index
    %c0_56 = arith.constant 0 : index
    %87 = vector.load %arg2[%c5_54, %c0_55, %c0_56] : memref<9x16x256xf32, #tpu.memory_space<vmem>>, vector<1x16x256xf32>
    %88 = vector.shape_cast %87 : vector<1x16x256xf32> to vector<16x256xf32>
    %89 = arith.mulf %86, %88 : vector<16x256xf32>
    %90 = arith.addf %85, %89 : vector<16x256xf32>
    %c241_i32_57 = arith.constant 241 : i32
    %91 = tpu.dynamic_rotate %62 by %c241_i32_57 dim 1 : vector<16x256xf32>, i32 -> vector<16x256xf32>
    %c6_58 = arith.constant 6 : index
    %c0_59 = arith.constant 0 : index
    %c0_60 = arith.constant 0 : index
    %92 = vector.load %arg2[%c6_58, %c0_59, %c0_60] : memref<9x16x256xf32, #tpu.memory_space<vmem>>, vector<1x16x256xf32>
    %93 = vector.shape_cast %92 : vector<1x16x256xf32> to vector<16x256xf32>
    %94 = arith.mulf %91, %93 : vector<16x256xf32>
    %95 = arith.addf %90, %94 : vector<16x256xf32>
    %c240_i32_61 = arith.constant 240 : i32
    %96 = tpu.dynamic_rotate %62 by %c240_i32_61 dim 1 : vector<16x256xf32>, i32 -> vector<16x256xf32>
    %c7_62 = arith.constant 7 : index
    %c0_63 = arith.constant 0 : index
    %c0_64 = arith.constant 0 : index
    %97 = vector.load %arg2[%c7_62, %c0_63, %c0_64] : memref<9x16x256xf32, #tpu.memory_space<vmem>>, vector<1x16x256xf32>
    %98 = vector.shape_cast %97 : vector<1x16x256xf32> to vector<16x256xf32>
    %99 = arith.mulf %96, %98 : vector<16x256xf32>
    %100 = arith.addf %95, %99 : vector<16x256xf32>
    %c239_i32_65 = arith.constant 239 : i32
    %101 = tpu.dynamic_rotate %62 by %c239_i32_65 dim 1 : vector<16x256xf32>, i32 -> vector<16x256xf32>
    %c8_66 = arith.constant 8 : index
    %c0_67 = arith.constant 0 : index
    %c0_68 = arith.constant 0 : index
    %102 = vector.load %arg2[%c8_66, %c0_67, %c0_68] : memref<9x16x256xf32, #tpu.memory_space<vmem>>, vector<1x16x256xf32>
    %103 = vector.shape_cast %102 : vector<1x16x256xf32> to vector<16x256xf32>
    %104 = arith.mulf %101, %103 : vector<16x256xf32>
    %105 = arith.addf %100, %104 : vector<16x256xf32>
    %cst_69 = arith.constant dense<0.000000e+00> : vector<8x256xf32>
    %106 = tpu.matmul %9, %105, %cst_69 {dimension_numbers = #tpu.dot_dimension_numbers<[1], [0], [0], [1], [0, 0, 1, 1], [], []>} : vector<8x16xf32>, vector<16x256xf32>, vector<8x256xf32> -> vector<8x256xf32>
    %107 = vector.broadcast %1 : vector<8x1xf32> to vector<8x256xf32>
    %108 = arith.addf %106, %107 : vector<8x256xf32>
    %cst_70 = arith.constant dense<0.000000e+00> : vector<8xf32>
    %109 = vector.multi_reduction <add>, %60, %cst_70 [1] : vector<8x256xf32> to vector<8xf32>
    %110 = vector.shape_cast %109 : vector<8xf32> to vector<8x1xf32>
    %cst_71 = arith.constant 0.000000e+00 : f32
    %111 = vector.broadcast %cst_71 : f32 to vector<8x1xf32>
    %112 = arith.addf %111, %110 : vector<8x1xf32>
    %cst_72 = arith.constant dense<0.000000e+00> : vector<8xf32>
    %113 = vector.multi_reduction <add>, %108, %cst_72 [1] : vector<8x256xf32> to vector<8xf32>
    %114 = vector.shape_cast %113 : vector<8xf32> to vector<8x1xf32>
    %115 = arith.addf %112, %114 : vector<8x1xf32>
    %cst_73 = arith.constant 0.001953125 : f32
    %116 = vector.broadcast %cst_73 : f32 to vector<8x1xf32>
    %117 = arith.mulf %115, %116 : vector<8x1xf32>
    %118 = vector.broadcast %117 : vector<8x1xf32> to vector<8x256xf32>
    %119 = arith.subf %60, %118 : vector<8x256xf32>
    %120 = vector.broadcast %117 : vector<8x1xf32> to vector<8x256xf32>
    %121 = arith.subf %60, %120 : vector<8x256xf32>
    %122 = arith.mulf %119, %121 : vector<8x256xf32>
    %cst_74 = arith.constant dense<0.000000e+00> : vector<8xf32>
    %123 = vector.multi_reduction <add>, %122, %cst_74 [1] : vector<8x256xf32> to vector<8xf32>
    %124 = vector.shape_cast %123 : vector<8xf32> to vector<8x1xf32>
    %cst_75 = arith.constant 0.000000e+00 : f32
    %125 = vector.broadcast %cst_75 : f32 to vector<8x1xf32>
    %126 = arith.addf %125, %124 : vector<8x1xf32>
    %127 = vector.broadcast %117 : vector<8x1xf32> to vector<8x256xf32>
    %128 = arith.subf %108, %127 : vector<8x256xf32>
    %129 = vector.broadcast %117 : vector<8x1xf32> to vector<8x256xf32>
    %130 = arith.subf %108, %129 : vector<8x256xf32>
    %131 = arith.mulf %128, %130 : vector<8x256xf32>
    %cst_76 = arith.constant dense<0.000000e+00> : vector<8xf32>
    %132 = vector.multi_reduction <add>, %131, %cst_76 [1] : vector<8x256xf32> to vector<8xf32>
    %133 = vector.shape_cast %132 : vector<8xf32> to vector<8x1xf32>
    %134 = arith.addf %126, %133 : vector<8x1xf32>
    %cst_77 = arith.constant 0.001953125 : f32
    %135 = vector.broadcast %cst_77 : f32 to vector<8x1xf32>
    %136 = arith.mulf %134, %135 : vector<8x1xf32>
    %cst_78 = arith.constant 9.99999974E-6 : f32
    %137 = vector.broadcast %cst_78 : f32 to vector<8x1xf32>
    %138 = arith.addf %136, %137 : vector<8x1xf32>
    %139 = math.rsqrt %138 : vector<8x1xf32>
    %140 = arith.mulf %2, %139 : vector<8x1xf32>
    %141 = arith.mulf %117, %140 : vector<8x1xf32>
    %142 = arith.subf %3, %141 : vector<8x1xf32>
    %143 = vector.broadcast %140 : vector<8x1xf32> to vector<8x256xf32>
    %144 = arith.mulf %60, %143 : vector<8x256xf32>
    %145 = vector.broadcast %142 : vector<8x1xf32> to vector<8x256xf32>
    %146 = arith.addf %144, %145 : vector<8x256xf32>
    %cst_79 = arith.constant 0.000000e+00 : f32
    %147 = vector.broadcast %cst_79 : f32 to vector<8x256xf32>
    %148 = arith.maximumf %146, %147 : vector<8x256xf32>
    %149 = vector.broadcast %140 : vector<8x1xf32> to vector<8x256xf32>
    %150 = arith.mulf %108, %149 : vector<8x256xf32>
    %151 = vector.broadcast %142 : vector<8x1xf32> to vector<8x256xf32>
    %152 = arith.addf %150, %151 : vector<8x256xf32>
    %cst_80 = arith.constant 0.000000e+00 : f32
    %153 = vector.broadcast %cst_80 : f32 to vector<8x256xf32>
    %154 = arith.maximumf %152, %153 : vector<8x256xf32>
    %cst_81 = arith.constant dense<0.000000e+00> : vector<8xf32>
    %155 = vector.multi_reduction <add>, %148, %cst_81 [1] : vector<8x256xf32> to vector<8xf32>
    %156 = vector.shape_cast %155 : vector<8xf32> to vector<8x1xf32>
    %cst_82 = arith.constant 2.560000e+02 : f32
    %157 = vector.broadcast %cst_82 : f32 to vector<8x1xf32>
    %158 = arith.divf %156, %157 : vector<8x1xf32>
    %cst_83 = arith.constant dense<0.000000e+00> : vector<8xf32>
    %159 = vector.multi_reduction <add>, %154, %cst_83 [1] : vector<8x256xf32> to vector<8xf32>
    %160 = vector.shape_cast %159 : vector<8xf32> to vector<8x1xf32>
    %cst_84 = arith.constant 2.560000e+02 : f32
    %161 = vector.broadcast %cst_84 : f32 to vector<8x1xf32>
    %162 = arith.divf %160, %161 : vector<8x1xf32>
    %163 = tpu.concatenate %158, %162 in 1 : vector<8x1xf32>, vector<8x1xf32> -> vector<8x2xf32>
    %cst_85 = arith.constant dense<0.000000e+00> : vector<2x2xf32>
    %164 = tpu.matmul %10, %163, %cst_85 {dimension_numbers = #tpu.dot_dimension_numbers<[1], [0], [0], [1], [0, 0, 1, 1], [], []>} : vector<2x8xf32>, vector<8x2xf32>, vector<2x2xf32> -> vector<2x2xf32>
    %165 = vector.broadcast %5 : vector<2x1xf32> to vector<2x2xf32>
    %166 = arith.addf %164, %165 : vector<2x2xf32>
    %cst_86 = arith.constant 0.000000e+00 : f32
    %167 = vector.broadcast %cst_86 : f32 to vector<2x2xf32>
    %168 = arith.maximumf %166, %167 : vector<2x2xf32>
    %cst_87 = arith.constant dense<0.000000e+00> : vector<8x2xf32>
    %169 = tpu.matmul %11, %168, %cst_87 {dimension_numbers = #tpu.dot_dimension_numbers<[1], [0], [0], [1], [0, 0, 1, 1], [], []>} : vector<8x2xf32>, vector<2x2xf32>, vector<8x2xf32> -> vector<8x2xf32>
    %170 = vector.broadcast %4 : vector<8x1xf32> to vector<8x2xf32>
    %171 = arith.addf %169, %170 : vector<8x2xf32>
    %172 = arith.negf %171 : vector<8x2xf32>
    %173 = math.exp %172 : vector<8x2xf32>
    %cst_88 = arith.constant 1.000000e+00 : f32
    %174 = vector.broadcast %cst_88 : f32 to vector<8x2xf32>
    %175 = arith.addf %174, %173 : vector<8x2xf32>
    %176 = arith.divf %174, %175 : vector<8x2xf32>
    %177 = vector.extract_strided_slice %176 {offsets = [0, 0], sizes = [8, 1], strides = [1, 1]} : vector<8x2xf32> to vector<8x1xf32>
    %178 = vector.broadcast %177 : vector<8x1xf32> to vector<8x256xf32>
    %179 = arith.mulf %148, %178 : vector<8x256xf32>
    %cst_89 = arith.constant dense<0.000000e+00> : vector<16x256xf32>
    %180 = tpu.matmul %12, %179, %cst_89 {dimension_numbers = #tpu.dot_dimension_numbers<[1], [0], [0], [1], [0, 0, 1, 1], [], []>} : vector<16x8xf32>, vector<8x256xf32>, vector<16x256xf32> -> vector<16x256xf32>
    %181 = vector.broadcast %6 : vector<16x1xf32> to vector<16x256xf32>
    %182 = arith.addf %180, %181 : vector<16x256xf32>
    %183 = vector.extract_strided_slice %176 {offsets = [0, 1], sizes = [8, 1], strides = [1, 1]} : vector<8x2xf32> to vector<8x1xf32>
    %184 = vector.broadcast %183 : vector<8x1xf32> to vector<8x256xf32>
    %185 = arith.mulf %154, %184 : vector<8x256xf32>
    %cst_90 = arith.constant dense<0.000000e+00> : vector<16x256xf32>
    %186 = tpu.matmul %12, %185, %cst_90 {dimension_numbers = #tpu.dot_dimension_numbers<[1], [0], [0], [1], [0, 0, 1, 1], [], []>} : vector<16x8xf32>, vector<8x256xf32>, vector<16x256xf32> -> vector<16x256xf32>
    %187 = vector.broadcast %6 : vector<16x1xf32> to vector<16x256xf32>
    %188 = arith.addf %186, %187 : vector<16x256xf32>
    %cst_91 = arith.constant dense<0.000000e+00> : vector<16xf32>
    %189 = vector.multi_reduction <add>, %182, %cst_91 [1] : vector<16x256xf32> to vector<16xf32>
    %190 = vector.shape_cast %189 : vector<16xf32> to vector<16x1xf32>
    %cst_92 = arith.constant 0.000000e+00 : f32
    %191 = vector.broadcast %cst_92 : f32 to vector<16x1xf32>
    %192 = arith.addf %191, %190 : vector<16x1xf32>
    %cst_93 = arith.constant dense<0.000000e+00> : vector<16xf32>
    %193 = vector.multi_reduction <add>, %188, %cst_93 [1] : vector<16x256xf32> to vector<16xf32>
    %194 = vector.shape_cast %193 : vector<16xf32> to vector<16x1xf32>
    %195 = arith.addf %192, %194 : vector<16x1xf32>
    %cst_94 = arith.constant 0.001953125 : f32
    %196 = vector.broadcast %cst_94 : f32 to vector<16x1xf32>
    %197 = arith.mulf %195, %196 : vector<16x1xf32>
    %198 = vector.broadcast %197 : vector<16x1xf32> to vector<16x256xf32>
    %199 = arith.subf %182, %198 : vector<16x256xf32>
    %200 = vector.broadcast %197 : vector<16x1xf32> to vector<16x256xf32>
    %201 = arith.subf %182, %200 : vector<16x256xf32>
    %202 = arith.mulf %199, %201 : vector<16x256xf32>
    %cst_95 = arith.constant dense<0.000000e+00> : vector<16xf32>
    %203 = vector.multi_reduction <add>, %202, %cst_95 [1] : vector<16x256xf32> to vector<16xf32>
    %204 = vector.shape_cast %203 : vector<16xf32> to vector<16x1xf32>
    %cst_96 = arith.constant 0.000000e+00 : f32
    %205 = vector.broadcast %cst_96 : f32 to vector<16x1xf32>
    %206 = arith.addf %205, %204 : vector<16x1xf32>
    %207 = vector.broadcast %197 : vector<16x1xf32> to vector<16x256xf32>
    %208 = arith.subf %188, %207 : vector<16x256xf32>
    %209 = vector.broadcast %197 : vector<16x1xf32> to vector<16x256xf32>
    %210 = arith.subf %188, %209 : vector<16x256xf32>
    %211 = arith.mulf %208, %210 : vector<16x256xf32>
    %cst_97 = arith.constant dense<0.000000e+00> : vector<16xf32>
    %212 = vector.multi_reduction <add>, %211, %cst_97 [1] : vector<16x256xf32> to vector<16xf32>
    %213 = vector.shape_cast %212 : vector<16xf32> to vector<16x1xf32>
    %214 = arith.addf %206, %213 : vector<16x1xf32>
    %cst_98 = arith.constant 0.001953125 : f32
    %215 = vector.broadcast %cst_98 : f32 to vector<16x1xf32>
    %216 = arith.mulf %214, %215 : vector<16x1xf32>
    %cst_99 = arith.constant 9.99999974E-6 : f32
    %217 = vector.broadcast %cst_99 : f32 to vector<16x1xf32>
    %218 = arith.addf %216, %217 : vector<16x1xf32>
    %219 = math.rsqrt %218 : vector<16x1xf32>
    %220 = arith.mulf %7, %219 : vector<16x1xf32>
    %221 = arith.mulf %197, %220 : vector<16x1xf32>
    %222 = arith.subf %8, %221 : vector<16x1xf32>
    %223 = vector.broadcast %220 : vector<16x1xf32> to vector<16x256xf32>
    %224 = arith.mulf %182, %223 : vector<16x256xf32>
    %225 = vector.broadcast %222 : vector<16x1xf32> to vector<16x256xf32>
    %226 = arith.addf %224, %225 : vector<16x256xf32>
    %c0_100 = arith.constant 0 : index
    %c0_101 = arith.constant 0 : index
    %c0_102 = arith.constant 0 : index
    %227 = vector.load %arg1[%c0_100, %c0_101, %c0_102] : memref<2x16x256xf32, #tpu.memory_space<vmem>>, vector<1x16x256xf32>
    %228 = vector.shape_cast %227 : vector<1x16x256xf32> to vector<16x256xf32>
    %229 = arith.addf %226, %228 : vector<16x256xf32>
    %cst_103 = arith.constant 0.000000e+00 : f32
    %230 = vector.broadcast %cst_103 : f32 to vector<16x256xf32>
    %231 = arith.maximumf %229, %230 : vector<16x256xf32>
    %c0_104 = arith.constant 0 : index
    %c0_105 = arith.constant 0 : index
    %c0_106 = arith.constant 0 : index
    %232 = vector.load %arg8[%c0_104, %c0_105, %c0_106] : memref<2x16x256xf32, #tpu.memory_space<vmem>>, vector<1x16x256xf32>
    %233 = vector.shape_cast %232 : vector<1x16x256xf32> to vector<16x256xf32>
    %234 = vector.shape_cast %231 : vector<16x256xf32> to vector<1x16x256xf32>
    tpu.vector_store %arg8[%c0_104, %c0_105, %c0_106], %234 {strides = array<i32>} : memref<2x16x256xf32, #tpu.memory_space<vmem>>, vector<1x16x256xf32>,
    %235 = vector.broadcast %220 : vector<16x1xf32> to vector<16x256xf32>
    %236 = arith.mulf %188, %235 : vector<16x256xf32>
    %237 = vector.broadcast %222 : vector<16x1xf32> to vector<16x256xf32>
    %238 = arith.addf %236, %237 : vector<16x256xf32>
    %c1_107 = arith.constant 1 : index
    %c0_108 = arith.constant 0 : index
    %c0_109 = arith.constant 0 : index
    %239 = vector.load %arg1[%c1_107, %c0_108, %c0_109] : memref<2x16x256xf32, #tpu.memory_space<vmem>>, vector<1x16x256xf32>
    %240 = vector.shape_cast %239 : vector<1x16x256xf32> to vector<16x256xf32>
    %241 = arith.addf %238, %240 : vector<16x256xf32>
    %cst_110 = arith.constant 0.000000e+00 : f32
    %242 = vector.broadcast %cst_110 : f32 to vector<16x256xf32>
    %243 = arith.maximumf %241, %242 : vector<16x256xf32>
    %c1_111 = arith.constant 1 : index
    %c0_112 = arith.constant 0 : index
    %c0_113 = arith.constant 0 : index
    %244 = vector.load %arg8[%c1_111, %c0_112, %c0_113] : memref<2x16x256xf32, #tpu.memory_space<vmem>>, vector<1x16x256xf32>
    %245 = vector.shape_cast %244 : vector<1x16x256xf32> to vector<16x256xf32>
    %246 = vector.shape_cast %243 : vector<16x256xf32> to vector<1x16x256xf32>
    tpu.vector_store %arg8[%c1_111, %c0_112, %c0_113], %246 {strides = array<i32>} : memref<2x16x256xf32, #tpu.memory_space<vmem>>, vector<1x16x256xf32>,
    return
  }
  func.func @transform_0(%arg0: i32) -> (i32, i32, i32) {
    %c0_i32 = arith.constant 0 : i32
    %c0_i32_0 = arith.constant 0 : i32
    %c0_i32_1 = arith.constant 0 : i32
    %c0_i32_2 = arith.constant 0 : i32
    return %c0_i32, %c0_i32_0, %c0_i32_1 : i32, i32, i32
  }
  func.func @transform_1(%arg0: i32) -> (i32, i32, i32) {
    %c0_i32 = arith.constant 0 : i32
    %c0_i32_0 = arith.constant 0 : i32
    %c0_i32_1 = arith.constant 0 : i32
    %c0_i32_2 = arith.constant 0 : i32
    return %c0_i32, %c0_i32_0, %c0_i32_1 : i32, i32, i32
  }
  func.func @transform_2(%arg0: i32) -> (i32, i32) {
    %c0_i32 = arith.constant 0 : i32
    %c0_i32_0 = arith.constant 0 : i32
    %c0_i32_1 = arith.constant 0 : i32
    return %c0_i32, %c0_i32_0 : i32, i32
  }
  func.func @transform_3(%arg0: i32) -> (i32, i32) {
    %c0_i32 = arith.constant 0 : i32
    %c0_i32_0 = arith.constant 0 : i32
    %c0_i32_1 = arith.constant 0 : i32
    return %c0_i32, %c0_i32_0 : i32, i32
  }
  func.func @transform_4(%arg0: i32) -> (i32, i32) {
    %c0_i32 = arith.constant 0 : i32
    %c0_i32_0 = arith.constant 0 : i32
    %c0_i32_1 = arith.constant 0 : i32
    return %c0_i32, %c0_i32_0 : i32, i32
  }
  func.func @transform_5(%arg0: i32) -> (i32, i32) {
    %c0_i32 = arith.constant 0 : i32
    %c0_i32_0 = arith.constant 0 : i32
    %c0_i32_1 = arith.constant 0 : i32
    return %c0_i32, %c0_i32_0 : i32, i32
  }
  func.func @transform_6(%arg0: i32) -> (i32, i32) {
    %c0_i32 = arith.constant 0 : i32
    %c0_i32_0 = arith.constant 0 : i32
    %c0_i32_1 = arith.constant 0 : i32
    return %c0_i32, %c0_i32_0 : i32, i32
  }
  func.func @transform_7(%arg0: i32) -> (i32, i32, i32) {
    %c0_i32 = arith.constant 0 : i32
    %c0_i32_0 = arith.constant 0 : i32
    %c0_i32_1 = arith.constant 0 : i32
    %c0_i32_2 = arith.constant 0 : i32
    return %c0_i32, %c0_i32_0, %c0_i32_1 : i32, i32, i32
  }
}

</mosaic_0001>

<bundles_post_ra>
// kernel: tpu_custom_call.1
= control target key start
LH: loop header
LB: loop body
LE: loop exit
PB: predicated region body
PF: predicated region fallthrough
CT: control target
= control target key end

     0   :  { %12 = vsyncpa [#allocation3], 0  ;;  %s1866_s0 = inlined_call_operand.hbm [shape: f32[2,16,256], index: 0, kind: input, shape index: {}]   ;;  %s1867_s1 = inlined_call_operand.hbm [shape: f32[9,16,256], index: 1, kind: input, shape index: {}]   ;;  %s1868_s2 = inlined_call_operand.vmem [shape: f32[8,16], index: 2, kind: input, shape index: {}]   ;;  %s1869_s3 = inlined_call_operand.vmem [shape: f32[2,8], index: 3, kind: input, shape index: {}]   ;;  %s1870_s4 = inlined_call_operand.vmem [shape: f32[8,2], index: 4, kind: input, shape index: {}]   ;;  %s1871_s5 = inlined_call_operand.vmem [shape: f32[16,8], index: 5, kind: input, shape index: {}]   ;;  %s1872_s6 = inlined_call_operand.vmem [shape: f32[16,8], index: 6, kind: input, shape index: {}]   ;;  %s1873_s7 = inlined_call_operand.hbm [shape: f32[2,16,256], index: 7, kind: output, shape index: {}]  }
   0x1   :  { %13 = vsyncpa [#allocation6], 0 }
   0x2   :  { %14 = vsyncpa [#allocation4], 0  ;;  %s1312_s24 = smov [#allocation2]  }
   0x3   :  { %s20_s25 = sshll.u32 %s1312_s24, 4  ;;  %s21_s25 = int_to_ptr.vmem [resolvable:$true] %s20_s25 }
   0x4   :  { %s1254_s26 = scalar_lea.vmem %s21_s25, 1024  ;;  %p1259_p1 = scmp.lt.s32.totalorder %s21_s25, %s21_s25 }
   0x5   :  { %p1255_p0 = scmp.ne.s32.totalorder %s21_s25, %s1254_s26  ;;  %p1260_p2 = scmp.lt.s32.totalorder %s1254_s26, %s1254_s26 }
   0x7   :  { %p1261_p3 = por %p1260_p2, %p1259_p1 }
   0x9   :  { %p1262_p4 = pnand %p1261_p3, %p1255_p0 }
   0xb   :  { %1265 = shalt.err (!%p1262_p4)
}
   0xc   :  { %s1313_s27 = smov 256   ;;  %s1314_s28 = smov 16  }
   0xd   :  { %26 = dma.hbm_to_vmem [thread:$0]  %s1866_s0, 1024, %s21_s25, [#allocation3], %s1313_s27, %s1313_s27, %s1314_s28  }
   0xe   :  { %s1315_s8 = smov [#allocation5]  }
   0xf   :  { %s32_s9 = sshll.u32 %s1315_s8, 4  ;;  %s33_s9 = int_to_ptr.vmem [resolvable:$true] %s32_s9 }
  0x10   :  { %s1274_s10 = scalar_lea.vmem %s33_s9, 4608  ;;  %p1279_p6 = scmp.lt.s32.totalorder %s33_s9, %s33_s9 }
  0x11   :  { %p1275_p5 = scmp.ne.s32.totalorder %s33_s9, %s1274_s10  ;;  %p1280_p7 = scmp.lt.s32.totalorder %s1274_s10, %s1274_s10 }
  0x13   :  { %p1281_p8 = por %p1280_p7, %p1279_p6 }
  0x15   :  { %p1282_p9 = pnand %p1281_p8, %p1275_p5 }
  0x17   :  { %1285 = shalt.err (!%p1282_p9)
}
  0x18   :  { %38 = dma.hbm_to_vmem [thread:$0]  %s1867_s1, 4608, %s33_s9, [#allocation6], %s1313_s27, %s1313_s27, %s1314_s28  }
  0x19   :  { %1306 = dma.done.wait [#allocation3], 1024  }
  0x1a   :  { %1307 = vsyncadd [#allocation3], 4294966272 }
  0x1b   :  { %1308 = dma.done.wait [#allocation6], 4608  }
  0x1c   :  { %1309 = vsyncadd [#allocation6], 4294962688  ;;  %v1386_v0 = vld [vmem:[#allocation2 + $0x30] sm:$0xff]  ;;  %s1316_s0 = smov 17   ;;  %v1392_v2 = vld [vmem:[#allocation2 + $0x38] sm:$0xff]  ;;  %s1317_s1 = smov 15   ;;  %v83_v8 = vlaneseq }
  0x1d   :  { %v1388_v1 = vld [vmem:[#allocation2 + $0x10] sm:$0xff]  ;;  %375 = vrot.lane.b32.xlu1 %v1386_v0, %s1316_s0  ;;  %v1394_v3 = vld [vmem:[#allocation2 + $0x18] sm:$0xff]  ;;  %v1398_v4 = vld [vmem:[#allocation2 + $0x8] sm:$0xff]  ;;  %s1318_s13 = smov 1   ;;  %s1319_s14 = smov 127   ;;  %v1323_v12 = vmov 0.0  }
  0x1e   :  { %77 = vrot.lane.b32.xlu0 %v1388_v1, %s1316_s0  ;;  %v1400_v5 = vld [vmem:[#allocation2] sm:$0xff]  ;;  %v1408_v6 = vld [vmem:[#allocation2 + $0x28] sm:$0xff]  ;;  %s1320_s15 = smov 113   ;;  %s1321_s16 = smov 112   ;;  %v1478_v9 = vand.u32 127, %v83_v8  ;;  %357 = vmatprep.mubr.f32.mxu0 %v1323_v12  ;;  %v1495_v17 = vld [vmem:[#allocation5 + $0x90] sm:$0xff] }
  0x1f   :  { %v1410_v7 = vld [vmem:[#allocation2 + $0x20] sm:$0xff]  ;;  %s1322_s17 = smov 111   ;;  %597 = vmatprep.mubr.f32.mxu1 %v1323_v12  ;;  %v1499_v18 = vld [vmem:[#allocation5 + $0x98] sm:$0xff]  ;;  %v1501_v19 = vld [vmem:[#allocation5 + $0x10] sm:$0xff]  ;;  %v1324_v23 = vmov 3   ;;  %v73_v25 = vmul.f32 %v1495_v17, %v1388_v1  ;;  %vm289_vm8 = vcmask 130048  }
  0x20   :  { %vm85_vm0 = vcmp.lt.s32.totalorder %v1478_v9, 17  ;;  %v1503_v20 = vld [vmem:[#allocation5 + $0x18] sm:$0xff]  ;;  %1220 = vset.pattern.permute.xlu0 %v1324_v23  ;;  %vm110_vm1 = vcmp.lt.s32.totalorder %v1478_v9, 16  ;;  %v74_v24 = vmul.f32 %v1499_v18, %v1394_v3  ;;  %v1518_v28 = vld [vmem:[#allocation5 + $0x30] sm:$0xff]  ;;  %v1525_v32 = vld [vmem:[%s1872_s6] sm:$0xff]  ;;  %vm136_vm2 = vcmp.lt.s32.totalorder %v1478_v9, 15 }
  0x21   :  { %379 = vrot.lane.b32.xlu1 %v1392_v2, %s1316_s0  ;;  %v1520_v29 = vld [vmem:[#allocation5 + $0x38] sm:$0xff]  ;;  %v67_v45 = vld [vmem:[#allocation5 + $0x80] sm:$0xff]  ;;  %v68_v46 = vld [vmem:[#allocation5 + $0x88] sm:$0xff]  ;;  %vm162_vm3 = vcmp.lt.s32.totalorder %v1478_v9, 1  ;;  %vm188_vm4 = vcmp.lt.s32.totalorder %v1478_v9, 127  ;;  %vm214_vm5 = vcmp.lt.s32.totalorder %v1478_v9, 113 }
  0x22   :  { %81 = vrot.lane.b32.xlu0 %v1394_v3, %s1316_s0  ;;  %v90_v47 = vld [vmem:[#allocation5] sm:$0xff]  ;;  %v91_v48 = vld [vmem:[#allocation5 + $0x8] sm:$0xff]  ;;  %v72_v55 = vmul.f32 %v68_v46, %v1398_v4  ;;  %v71_v56 = vmul.f32 %v67_v45, %v1400_v5  ;;  %vm240_vm6 = vcmp.lt.s32.totalorder %v1478_v9, 112  ;;  %vm266_vm7 = vcmp.lt.s32.totalorder %v1478_v9, 111 }
  0x23   :  { %v116_v59 = vld [vmem:[#allocation5 + $0x20] sm:$0xff]  ;;  %v117_v60 = vld [vmem:[#allocation5 + $0x28] sm:$0xff]  ;;  %vm1327_vm9 = vmmov 0   ;;  %vm670_vm10 = vcmask 7168   ;;  %vm676_vm11 = vcmask 64512   ;;  %vm759_vm12 = vcmask 1041408  }
  0x24   :  { %vm755_vm13 = vcmask 15360  }
  0x25   :  { %79 = vrot.lane.b32.xlu1 %v1398_v4, %s1316_s0 }
  0x26   :  { %75 = vrot.lane.b32.xlu0 %v1400_v5, %s1316_s0 }
  0x29   :  { %108 = vrot.lane.b32.xlu1 %v1394_v3, %s1314_s28 }
  0x2a   :  { %104 = vrot.lane.b32.xlu0 %v1388_v1, %s1314_s28 }
  0x2d   :  { %377 = vrot.lane.b32.xlu1 %v1408_v6, %s1316_s0 }
  0x2e   :  { %373 = vrot.lane.b32.xlu0 %v1410_v7, %s1316_s0 }
  0x31   :  { %399 = vrot.lane.b32.xlu1 %v1392_v2, %s1314_s28 }
  0x32   :  { %395 = vrot.lane.b32.xlu0 %v1386_v0, %s1314_s28 }
  0x35   :  { %106 = vrot.lane.b32.xlu1 %v1398_v4, %s1314_s28 }
  0x36   :  { %102 = vrot.lane.b32.xlu0 %v1400_v5, %s1314_s28 }
  0x39   :  { %134 = vrot.lane.b32.xlu1 %v1394_v3, %s1317_s1 }
  0x3a   :  { %130 = vrot.lane.b32.xlu0 %v1388_v1, %s1317_s1 }
  0x3d   :  { %397 = vrot.lane.b32.xlu1 %v1408_v6, %s1314_s28 }
  0x3e   :  { %393 = vrot.lane.b32.xlu0 %v1410_v7, %s1314_s28 }
  0x41   :  { %419 = vrot.lane.b32.xlu1 %v1392_v2, %s1317_s1 }
  0x42   :  { %415 = vrot.lane.b32.xlu0 %v1386_v0, %s1317_s1 }
  0x45   :  { %132 = vrot.lane.b32.xlu1 %v1398_v4, %s1317_s1 }
  0x46   :  { %128 = vrot.lane.b32.xlu0 %v1400_v5, %s1317_s1 }
  0x49   :  { %160 = vrot.lane.b32.xlu1 %v1394_v3, %s1318_s13 }
  0x4a   :  { %156 = vrot.lane.b32.xlu0 %v1388_v1, %s1318_s13 }
  0x4d   :  { %417 = vrot.lane.b32.xlu1 %v1408_v6, %s1317_s1 }
  0x4e   :  { %413 = vrot.lane.b32.xlu0 %v1410_v7, %s1317_s1 }
  0x51   :  { %439 = vrot.lane.b32.xlu1 %v1392_v2, %s1318_s13 }
  0x52   :  { %435 = vrot.lane.b32.xlu0 %v1386_v0, %s1318_s13 }
  0x55   :  { %158 = vrot.lane.b32.xlu1 %v1398_v4, %s1318_s13 }
  0x56   :  { %154 = vrot.lane.b32.xlu0 %v1400_v5, %s1318_s13 }
  0x59   :  { %186 = vrot.lane.b32.xlu1 %v1394_v3, %s1319_s14 }
  0x5a   :  { %182 = vrot.lane.b32.xlu0 %v1388_v1, %s1319_s14 }
  0x5d   :  { %437 = vrot.lane.b32.xlu1 %v1408_v6, %s1318_s13 }
  0x5e   :  { %433 = vrot.lane.b32.xlu0 %v1410_v7, %s1318_s13 }
  0x61   :  { %459 = vrot.lane.b32.xlu1 %v1392_v2, %s1319_s14 }
  0x62   :  { %455 = vrot.lane.b32.xlu0 %v1386_v0, %s1319_s14 }
  0x65   :  { %184 = vrot.lane.b32.xlu1 %v1398_v4, %s1319_s14 }
  0x66   :  { %180 = vrot.lane.b32.xlu0 %v1400_v5, %s1319_s14 }
  0x69   :  { %212 = vrot.lane.b32.xlu1 %v1394_v3, %s1320_s15 }
  0x6a   :  { %208 = vrot.lane.b32.xlu0 %v1388_v1, %s1320_s15 }
  0x6d   :  { %457 = vrot.lane.b32.xlu1 %v1408_v6, %s1319_s14 }
  0x6e   :  { %453 = vrot.lane.b32.xlu0 %v1410_v7, %s1319_s14 }
  0x71   :  { %479 = vrot.lane.b32.xlu1 %v1392_v2, %s1320_s15 }
  0x72   :  { %475 = vrot.lane.b32.xlu0 %v1386_v0, %s1320_s15 }
  0x75   :  { %210 = vrot.lane.b32.xlu1 %v1398_v4, %s1320_s15 }
  0x76   :  { %206 = vrot.lane.b32.xlu0 %v1400_v5, %s1320_s15 }
  0x79   :  { %238 = vrot.lane.b32.xlu1 %v1394_v3, %s1321_s16 }
  0x7a   :  { %234 = vrot.lane.b32.xlu0 %v1388_v1, %s1321_s16 }
  0x7d   :  { %477 = vrot.lane.b32.xlu1 %v1408_v6, %s1320_s15 }
  0x7e   :  { %473 = vrot.lane.b32.xlu0 %v1410_v7, %s1320_s15 }
  0x81   :  { %499 = vrot.lane.b32.xlu1 %v1392_v2, %s1321_s16 }
  0x82   :  { %495 = vrot.lane.b32.xlu0 %v1386_v0, %s1321_s16 }
  0x85   :  { %236 = vrot.lane.b32.xlu1 %v1398_v4, %s1321_s16 }
  0x86   :  { %232 = vrot.lane.b32.xlu0 %v1400_v5, %s1321_s16 }
  0x89   :  { %264 = vrot.lane.b32.xlu1 %v1394_v3, %s1322_s17 }
  0x8a   :  { %260 = vrot.lane.b32.xlu0 %v1388_v1, %s1322_s17 }
  0x8d   :  { %497 = vrot.lane.b32.xlu1 %v1408_v6, %s1321_s16 }
  0x8e   :  { %493 = vrot.lane.b32.xlu0 %v1410_v7, %s1321_s16 }
  0x8f   :  { %v1480_v10 = vpop.permute.xlu1 %375 }
  0x90   :  { %v78_v11 = vpop.permute.xlu0 %77 }
  0x91   :  { %519 = vrot.lane.b32.xlu1 %v1392_v2, %s1322_s17 }
  0x92   :  { %515 = vrot.lane.b32.xlu0 %v1386_v0, %s1322_s17 }
  0x93   :  { %v1489_v13 = vpop.permute.xlu1 %379 }
  0x94   :  { %v82_v14 = vpop.permute.xlu0 %81 }
  0x95   :  { %v87_v15 = vsel %vm85_vm0, %v78_v11, %v82_v14  ;;  %v89_v16 = vsel %vm85_vm0, %v82_v14, %v78_v11  ;;  %262 = vrot.lane.b32.xlu1 %v1398_v4, %s1322_s17  ;;  %v370_v14 = vmul.f32 %v1408_v6, %v68_v46 }
  0x96   :  { %258 = vrot.lane.b32.xlu0 %v1400_v5, %s1322_s17  ;;  %v96_v26 = vmul.f32 %v1501_v19, %v89_v16  ;;  %v97_v27 = vmul.f32 %v1503_v20, %v87_v15  ;;  %v369_v5 = vmul.f32 %v1410_v7, %v67_v45  ;;  %v144_v15 = vld [vmem:[#allocation5 + $0x50] sm:$0xff]  ;;  %v145_v16 = vld [vmem:[#allocation5 + $0x58] sm:$0xff] }
  0x97   :  { %v80_v21 = vpop.permute.xlu1 %79 }
  0x98   :  { %v76_v22 = vpop.permute.xlu0 %75  ;;  %v100_v35 = vadd.f32 %v96_v26, %v73_v25  ;;  %v101_v36 = vadd.f32 %v97_v27, %v74_v24 }
  0x99   :  { %517 = vrot.lane.b32.xlu1 %v1408_v6, %s1322_s17  ;;  %v86_v49 = vsel %vm85_vm0, %v76_v22, %v80_v21  ;;  %v88_v50 = vsel %vm85_vm0, %v80_v21, %v76_v22  ;;  %v382_v21 = vsel %vm85_vm0, %v1480_v10, %v1489_v13  ;;  %v384_v22 = vsel %vm85_vm0, %v1489_v13, %v1480_v10 }
  0x9a   :  { %513 = vrot.lane.b32.xlu0 %v1410_v7, %s1322_s17  ;;  %v94_v57 = vmul.f32 %v90_v47, %v88_v50  ;;  %v95_v58 = vmul.f32 %v91_v48, %v86_v49  ;;  %v372_v10 = vmul.f32 %v1392_v2, %v1499_v18  ;;  %v387_v13 = vmul.f32 %v384_v22, %v1501_v19 }
  0x9b   :  { %v109_v30 = vpop.permute.xlu1 %108 }
  0x9c   :  { %v105_v31 = vpop.permute.xlu0 %104  ;;  %v98_v3 = vadd.f32 %v94_v57, %v71_v56  ;;  %v99_v8 = vadd.f32 %v95_v58, %v72_v55 }
  0x9d   :  { %v112_v33 = vsel %vm110_vm1, %v105_v31, %v109_v30  ;;  %v114_v34 = vsel %vm110_vm1, %v109_v30, %v105_v31 }
  0x9e   :  { %v122_v37 = vmul.f32 %v1518_v28, %v114_v34  ;;  %v123_v38 = vmul.f32 %v1520_v29, %v112_v33  ;;  %286 = vperm.xlu0 %1220, %v1525_v32   ;;  %v371_v34 = vmul.f32 %v1386_v0, %v1495_v17 }
  0x9f   :  { %v378_v41 = vpop.permute.xlu1 %377 }
  0xa0   :  { %v126_v39 = vadd.f32 %v122_v37, %v100_v35  ;;  %v127_v40 = vadd.f32 %v123_v38, %v101_v36  ;;  %v374_v42 = vpop.permute.xlu0 %373  ;;  %v388_v35 = vmul.f32 %v382_v21, %v1503_v20  ;;  %v391_v20 = vadd.f32 %v387_v13, %v371_v34 }
  0xa1   :  { %v381_v43 = vsel %vm85_vm0, %v374_v42, %v378_v41  ;;  %v383_v44 = vsel %vm85_vm0, %v378_v41, %v374_v42 }
  0xa2   :  { %v385_v27 = vmul.f32 %v383_v44, %v90_v47  ;;  %v386_v7 = vmul.f32 %v381_v43, %v91_v48 }
  0xa3   :  { %v400_v51 = vpop.permute.xlu1 %399 }
  0xa4   :  { %v396_v52 = vpop.permute.xlu0 %395  ;;  %v389_v42 = vadd.f32 %v385_v27, %v369_v5  ;;  %v390_v43 = vadd.f32 %v386_v7, %v370_v14 }
  0xa5   :  { %v402_v53 = vsel %vm110_vm1, %v396_v52, %v400_v51  ;;  %v404_v54 = vsel %vm110_vm1, %v400_v51, %v396_v52 }
  0xa6   :  { %v407_v2 = vmul.f32 %v404_v54, %v1518_v28  ;;  %v408_v17 = vmul.f32 %v402_v53, %v1520_v29  ;;  %v142_v54 = vld [vmem:[#allocation5 + $0x40] sm:$0xff]  ;;  %v143_v29 = vld [vmem:[#allocation5 + $0x48] sm:$0xff] }
  0xa7   :  { %v107_v61 = vpop.permute.xlu1 %106 }
  0xa8   :  { %v103_v62 = vpop.permute.xlu0 %102  ;;  %v411_v50 = vadd.f32 %v407_v2, %v391_v20 }
  0xa9   :  { %v111_v63 = vsel %vm110_vm1, %v103_v62, %v107_v61  ;;  %v113_v1 = vsel %vm110_vm1, %v107_v61, %v103_v62 }
  0xaa   :  { %v120_v11 = vmul.f32 %v116_v59, %v113_v1  ;;  %v121_v4 = vmul.f32 %v117_v60, %v111_v63 }
  0xab   :  { %v135_v25 = vpop.permute.xlu1 %134 }
  0xac   :  { %v124_v23 = vadd.f32 %v120_v11, %v98_v3  ;;  %v125_v24 = vadd.f32 %v121_v4, %v99_v8  ;;  %v131_v26 = vpop.permute.xlu0 %130 }
  0xad   :  { %v138_v6 = vsel %vm136_vm2, %v131_v26, %v135_v25  ;;  %v140_v30 = vsel %vm136_vm2, %v135_v25, %v131_v26 }
  0xae   :  { %v148_v31 = vmul.f32 %v144_v15, %v140_v30  ;;  %v149_v33 = vmul.f32 %v145_v16, %v138_v6 }
  0xaf   :  { %v398_v38 = vpop.permute.xlu1 %397 }
  0xb0   :  { %v1573_v36 = vadd.f32 %v148_v31, %v126_v39  ;;  %v1575_v37 = vadd.f32 %v149_v33, %v127_v40  ;;  %v394_v41 = vpop.permute.xlu0 %393  ;;  %v392_v39 = vadd.f32 %v388_v35, %v372_v10 }
  0xb1   :  { %v401_v44 = vsel %vm110_vm1, %v394_v41, %v398_v38  ;;  %v403_v0 = vsel %vm110_vm1, %v398_v38, %v394_v41 }
  0xb2   :  { %v405_v18 = vmul.f32 %v403_v0, %v116_v59  ;;  %v406_v19 = vmul.f32 %v401_v44, %v117_v60  ;;  %v412_v51 = vadd.f32 %v408_v17, %v392_v39  ;;  %v170_v17 = vld [vmem:[#allocation5 + $0x70] sm:$0xff] }
  0xb3   :  { %v420_v46 = vpop.permute.xlu1 %419 }
  0xb4   :  { %v409_v40 = vadd.f32 %v405_v18, %v389_v42  ;;  %v410_v45 = vadd.f32 %v406_v19, %v390_v43  ;;  %v416_v47 = vpop.permute.xlu0 %415  ;;  %v171_v18 = vld [vmem:[#allocation5 + $0x78] sm:$0xff] }
  0xb5   :  { %v422_v48 = vsel %vm136_vm2, %v416_v47, %v420_v46  ;;  %v424_v49 = vsel %vm136_vm2, %v420_v46, %v416_v47  ;;  %v197_v46 = vld [vmem:[#allocation5 + $0xb8] sm:$0xff] }
  0xb6   :  { %v427_v52 = vmul.f32 %v424_v49, %v144_v15  ;;  %v428_v28 = vmul.f32 %v422_v48, %v145_v16 }
  0xb7   :  { %v133_v56 = vpop.permute.xlu1 %132 }
  0xb8   :  { %v1587_v53 = vadd.f32 %v427_v52, %v411_v50  ;;  %v1589_v55 = vadd.f32 %v428_v28, %v412_v51  ;;  %v129_v57 = vpop.permute.xlu0 %128 }
  0xb9   :  { %v137_v58 = vsel %vm136_vm2, %v129_v57, %v133_v56  ;;  %v139_v59 = vsel %vm136_vm2, %v133_v56, %v129_v57  ;;  %v1647_v56 = vld [vmem:[#allocation5 + $0x68] sm:$0xff] }
  0xba   :  { %v146_v60 = vmul.f32 %v142_v54, %v139_v59  ;;  %v147_v61 = vmul.f32 %v143_v29, %v137_v58 }
  0xbb   :  { %v161_v1 = vpop.permute.xlu1 %160 }
  0xbc   :  { %v1595_v62 = vadd.f32 %v146_v60, %v124_v23  ;;  %v1597_v63 = vadd.f32 %v147_v61, %v125_v24  ;;  %v157_v3 = vpop.permute.xlu0 %156  ;;  %v222_v61 = vld [vmem:[#allocation5 + $0xd0] sm:$0xff] }
  0xbd   :  { %v164_v19 = vsel %vm162_vm3, %v157_v3, %v161_v1  ;;  %v166_v20 = vsel %vm162_vm3, %v161_v1, %v157_v3  ;;  %v223_v1 = vld [vmem:[#allocation5 + $0xd8] sm:$0xff] }
  0xbe   :  { %v174_v51 = vmul.f32 %v170_v17, %v166_v20  ;;  %v175_v52 = vmul.f32 %v171_v18, %v164_v19  ;;  %v194_v20 = vld [vmem:[#allocation5 + $0xa0] sm:$0xff] }
  0xbf   :  { %v418_v8 = vpop.permute.xlu1 %417 }
  0xc0   :  { %v414_v11 = vpop.permute.xlu0 %413 }
  0xc1   :  { %v421_v4 = vsel %vm136_vm2, %v414_v11, %v418_v8  ;;  %v423_v5 = vsel %vm136_vm2, %v418_v8, %v414_v11 }
  0xc2   :  { %v425_v14 = vmul.f32 %v423_v5, %v142_v54  ;;  %v426_v15 = vmul.f32 %v421_v4, %v143_v29  ;;  %v1645_v29 = vld [vmem:[#allocation5 + $0x60] sm:$0xff]  ;;  %v178_v5 = vadd.f32 %v174_v51, %v1573_v36 }
  0xc3   :  { %v440_v22 = vpop.permute.xlu1 %439 }
  0xc4   :  { %v1603_v16 = vadd.f32 %v425_v14, %v409_v40  ;;  %v1605_v21 = vadd.f32 %v426_v15, %v410_v45  ;;  %v436_v23 = vpop.permute.xlu0 %435  ;;  %v196_v45 = vld [vmem:[#allocation5 + $0xb0] sm:$0xff]  ;;  %v179_v14 = vadd.f32 %v175_v52, %v1575_v37 }
  0xc5   :  { %v442_v39 = vsel %vm162_vm3, %v436_v23, %v440_v22  ;;  %v444_v40 = vsel %vm162_vm3, %v440_v22, %v436_v23 }
  0xc6   :  { %v447_v28 = vmul.f32 %v444_v40, %v170_v17  ;;  %v448_v54 = vmul.f32 %v442_v39, %v171_v18  ;;  %v195_v39 = vld [vmem:[#allocation5 + $0xa8] sm:$0xff] }
  0xc7   :  { %v159_v24 = vpop.permute.xlu1 %158 }
  0xc8   :  { %v155_v25 = vpop.permute.xlu0 %154  ;;  %v451_v15 = vadd.f32 %v447_v28, %v1587_v53  ;;  %v452_v22 = vadd.f32 %v448_v54, %v1589_v55 }
  0xc9   :  { %v163_v57 = vsel %vm162_vm3, %v155_v25, %v159_v24  ;;  %v165_v58 = vsel %vm162_vm3, %v159_v24, %v155_v25  ;;  %v248_v25 = vld [vmem:[#allocation5 + $0xf0] sm:$0xff] }
  0xca   :  { %v172_v23 = vmul.f32 %v1645_v29, %v165_v58  ;;  %v173_v24 = vmul.f32 %v1647_v56, %v163_v57  ;;  %v275_v57 = vld [vmem:[#allocation5 + $0x118] sm:$0xff] }
  0xcb   :  { %v187_v26 = vpop.permute.xlu1 %186 }
  0xcc   :  { %v183_v27 = vpop.permute.xlu0 %182  ;;  %v177_v51 = vadd.f32 %v173_v24, %v1597_v63 }
  0xcd   :  { %v190_v47 = vsel %vm188_vm4, %v183_v27, %v187_v26  ;;  %v192_v48 = vsel %vm188_vm4, %v187_v26, %v183_v27  ;;  %v249_v26 = vld [vmem:[#allocation5 + $0xf8] sm:$0xff] }
  0xce   :  { %v200_v59 = vmul.f32 %v196_v45, %v190_v47  ;;  %v201_v60 = vmul.f32 %v197_v46, %v192_v48  ;;  %v176_v48 = vadd.f32 %v172_v23, %v1595_v62 }
  0xcf   :  { %v1607_v7 = vpop.permute.xlu1 %437 }
  0xd0   :  { %v1609_v6 = vpop.permute.xlu0 %433  ;;  %v205_v36 = vadd.f32 %v201_v60, %v179_v14 }
  0xd3   :  { %v1611_v30 = vpop.permute.xlu1 %459 }
  0xd4   :  { %v456_v31 = vpop.permute.xlu0 %455 }
  0xd5   :  { %v462_v53 = vsel %vm188_vm4, %v456_v31, %v1611_v30  ;;  %v464_v55 = vsel %vm188_vm4, %v1611_v30, %v456_v31 }
  0xd6   :  { %v467_v52 = vmul.f32 %v462_v53, %v196_v45  ;;  %v468_v28 = vmul.f32 %v464_v55, %v197_v46 }
  0xd7   :  { %v1613_v33 = vpop.permute.xlu1 %184 }
  0xd8   :  { %v181_v34 = vpop.permute.xlu0 %180  ;;  %v471_v24 = vadd.f32 %v467_v52, %v451_v15 }
  0xd9   :  { %v189_v18 = vsel %vm188_vm4, %v181_v34, %v1613_v33 }
  0xda   :  { %v198_v58 = vmul.f32 %v194_v20, %v189_v18 }
  0xdb   :  { %v213_v10 = vpop.permute.xlu1 %212 }
  0xdc   :  { %v209_v13 = vpop.permute.xlu0 %208  ;;  %v202_v55 = vadd.f32 %v198_v58, %v176_v48 }
  0xdd   :  { %v216_v3 = vsel %vm214_vm5, %v209_v13, %v213_v10  ;;  %v218_v8 = vsel %vm214_vm5, %v213_v10, %v209_v13  ;;  %v204_v13 = vadd.f32 %v200_v59, %v178_v5 }
  0xde   :  { %v226_v17 = vmul.f32 %v222_v61, %v216_v3  ;;  %v227_v37 = vmul.f32 %v223_v1, %v218_v8 }
  0xdf   :  { %v1615_v35 = vpop.permute.xlu1 %457 }
  0xe0   :  { %v1617_v38 = vpop.permute.xlu0 %453  ;;  %v230_v54 = vadd.f32 %v226_v17, %v204_v13  ;;  %v221_v13 = vld [vmem:[#allocation5 + $0xc8] sm:$0xff] }
  0xe1   :  { %v463_v15 = vsel %vm188_vm4, %v1615_v35, %v1617_v38 }
  0xe3   :  { %v1619_v41 = vpop.permute.xlu1 %479 }
  0xe4   :  { %v476_v42 = vpop.permute.xlu0 %475 }
  0xe5   :  { %v482_v40 = vsel %vm214_vm5, %v476_v42, %v1619_v41  ;;  %v484_v30 = vsel %vm214_vm5, %v1619_v41, %v476_v42  ;;  %v274_v41 = vld [vmem:[#allocation5 + $0x110] sm:$0xff]  ;;  %v231_v42 = vadd.f32 %v227_v37, %v205_v36 }
  0xe6   :  { %v487_v59 = vmul.f32 %v482_v40, %v222_v61  ;;  %v488_v63 = vmul.f32 %v484_v30, %v223_v1  ;;  %v246_v30 = vld [vmem:[#allocation5 + $0xe0] sm:$0xff] }
  0xe7   :  { %v1621_v43 = vpop.permute.xlu1 %210 }
  0xe8   :  { %v1623_v44 = vpop.permute.xlu0 %206 }
  0xe9   :  { %v215_v36 = vsel %vm214_vm5, %v1623_v44, %v1621_v43 }
  0xeb   :  { %v239_v0 = vpop.permute.xlu1 %238 }
  0xec   :  { %v235_v2 = vpop.permute.xlu0 %234 }
  0xed   :  { %v242_v27 = vsel %vm240_vm6, %v235_v2, %v239_v0  ;;  %v244_v10 = vsel %vm240_vm6, %v239_v0, %v235_v2  ;;  %v191_v0 = vsel %vm188_vm4, %v1613_v33, %v181_v34  ;;  %v441_v33 = vsel %vm162_vm3, %v1609_v6, %v1607_v7 }
  0xee   :  { %v252_v31 = vmul.f32 %v248_v25, %v242_v27  ;;  %v253_v47 = vmul.f32 %v249_v26, %v244_v10  ;;  %v443_v34 = vsel %vm162_vm3, %v1607_v7, %v1609_v6  ;;  %v199_v62 = vmul.f32 %v195_v39, %v191_v0  ;;  %v220_v10 = vld [vmem:[#allocation5 + $0xc0] sm:$0xff] }
  0xef   :  { %v1640_v49 = vpop.permute.xlu1 %477  ;;  %v445_v61 = vmul.f32 %v443_v34, %v1645_v29  ;;  %v446_v1 = vmul.f32 %v441_v33, %v1647_v56  ;;  %v472_v27 = vadd.f32 %v468_v28, %v452_v22  ;;  %v461_v56 = vsel %vm188_vm4, %v1617_v38, %v1615_v35 }
  0xf0   :  { %v1642_v50 = vpop.permute.xlu0 %473  ;;  %v257_v14 = vadd.f32 %v253_v47, %v231_v42  ;;  %v256_v7 = vadd.f32 %v252_v31, %v230_v54  ;;  %v203_v18 = vadd.f32 %v199_v62, %v177_v51  ;;  %v491_v0 = vadd.f32 %v487_v59, %v471_v24  ;;  %v247_v31 = vld [vmem:[#allocation5 + $0xe8] sm:$0xff] }
  0xf1   :  { %v465_v34 = vmul.f32 %v461_v56, %v194_v20  ;;  %v466_v35 = vmul.f32 %v463_v15, %v195_v39  ;;  %v481_v38 = vsel %vm214_vm5, %v1642_v50, %v1640_v49  ;;  %v449_v42 = vadd.f32 %v445_v61, %v1603_v16 }
  0xf2   :  { %v450_v58 = vadd.f32 %v446_v1, %v1605_v21 }
  0xf3   :  { %v500_v11 = vpop.permute.xlu1 %499 }
  0xf4   :  { %v496_v4 = vpop.permute.xlu0 %495 }
  0xf5   :  { %v502_v6 = vsel %vm240_vm6, %v496_v4, %v500_v11  ;;  %v504_v45 = vsel %vm240_vm6, %v500_v11, %v496_v4  ;;  %v217_v11 = vsel %vm214_vm5, %v1621_v43, %v1623_v44  ;;  %v492_v43 = vadd.f32 %v488_v63, %v472_v27 }
  0xf6   :  { %v507_v22 = vmul.f32 %v502_v6, %v248_v25  ;;  %v508_v53 = vmul.f32 %v504_v45, %v249_v26  ;;  %v224_v44 = vmul.f32 %v220_v10, %v215_v36  ;;  %v225_v40 = vmul.f32 %v221_v13, %v217_v11 }
  0xf7   :  { %v237_v2 = vpop.permute.xlu1 %236  ;;  %v483_v25 = vsel %vm214_vm5, %v1640_v49, %v1642_v50 }
  0xf8   :  { %v233_v19 = vpop.permute.xlu0 %232  ;;  %v511_v20 = vadd.f32 %v507_v22, %v491_v0  ;;  %v228_v62 = vadd.f32 %v224_v44, %v202_v55  ;;  %v229_v49 = vadd.f32 %v225_v40, %v203_v18 }
  0xf9   :  { %v241_v47 = vsel %vm240_vm6, %v233_v19, %v237_v2  ;;  %v243_v33 = vsel %vm240_vm6, %v237_v2, %v233_v19  ;;  %v512_v19 = vadd.f32 %v508_v53, %v492_v43 }
  0xfa   :  { %v250_v39 = vmul.f32 %v246_v30, %v241_v47  ;;  %v251_v52 = vmul.f32 %v247_v31, %v243_v33 }
  0xfb   :  { %v265_v60 = vpop.permute.xlu1 %264 }
  0xfc   :  { %v261_v3 = vpop.permute.xlu0 %260  ;;  %v254_v6 = vadd.f32 %v250_v39, %v228_v62  ;;  %v255_v21 = vadd.f32 %v251_v52, %v229_v49  ;;  %v1325_v62 = vmov 4  }
  0xfd   :  { %v268_v8 = vsel %vm266_vm7, %v261_v3, %v265_v60  ;;  %v270_v5 = vsel %vm266_vm7, %v265_v60, %v261_v3  ;;  %v272_v60 = vld [vmem:[#allocation5 + $0x100] sm:$0xff]  ;;  %v273_v3 = vld [vmem:[#allocation5 + $0x108] sm:$0xff]  ;;  %1221 = vset.pattern.permute.xlu0 %v1325_v62 }
  0xfe   :  { %v278_v46 = vmul.f32 %v274_v41, %v268_v8  ;;  %v279_v23 = vmul.f32 %v275_v57, %v270_v5 }
  0xff   :  { %v498_v4 = vpop.permute.xlu1 %497 }
 0x100   :  { %v494_v17 = vpop.permute.xlu0 %493  ;;  %v283_v37 = vadd.f32 %v279_v23, %v257_v14  ;;  %v282_v29 = vadd.f32 %v278_v46, %v256_v7  ;;  %v469_v14 = vadd.f32 %v465_v34, %v449_v42  ;;  %v486_v7 = vmul.f32 %v483_v25, %v221_v13 }
 0x101   :  { %v501_v50 = vsel %vm240_vm6, %v494_v17, %v498_v4  ;;  %v503_v59 = vsel %vm240_vm6, %v498_v4, %v494_v17 }
 0x102   :  { %321 = vmatprep.subr.mxu0 %v283_v37  ;;  %v505_v23 = vmul.f32 %v501_v50, %v246_v30  ;;  %v506_v61 = vmul.f32 %v503_v59, %v247_v31 }
 0x103   :  { %322 = vmatpush1.msra.mxu0 %v282_v29  ;;  %v520_v26 = vpop.permute.xlu1 %519  ;;  %v57_v29 = vld [vmem:[%s1868_s2] sm:$0xff] }
 0x104   :  { %v516_v48 = vpop.permute.xlu0 %515 }
 0x105   :  { %v522_v51 = vsel %vm266_vm7, %v516_v48, %v520_v26  ;;  %v524_v2 = vsel %vm266_vm7, %v520_v26, %v516_v48 }
 0x106   :  { %v527_v28 = vmul.f32 %v522_v51, %v274_v41  ;;  %v528_v54 = vmul.f32 %v524_v2, %v275_v57  ;;  %v470_v41 = vadd.f32 %v466_v35, %v450_v58  ;;  %v485_v57 = vmul.f32 %v481_v38, %v220_v10 }
 0x107   :  { %v263_v63 = vpop.permute.xlu1 %262 }
 0x108   :  { %v532_v8 = vadd.f32 %v528_v54, %v512_v19  ;;  %v531_v5 = vadd.f32 %v527_v28, %v511_v20  ;;  %v259_v16 = vpop.permute.xlu0 %258  ;;  %v489_v36 = vadd.f32 %v485_v57, %v469_v14  ;;  %v490_v11 = vadd.f32 %v486_v7, %v470_v41 }
 0x109   :  { %v267_v45 = vsel %vm266_vm7, %v259_v16, %v263_v63  ;;  %v269_v46 = vsel %vm266_vm7, %v263_v63, %v259_v16 }
 0x10a   :  { %561 = vmatprep.subr.mxu1 %v532_v8  ;;  %v276_v1 = vmul.f32 %v272_v60, %v267_v45  ;;  %v277_v24 = vmul.f32 %v273_v3, %v269_v46  ;;  %v509_v56 = vadd.f32 %v505_v23, %v489_v36  ;;  %v510_v15 = vadd.f32 %v506_v61, %v490_v11 }
 0x10b   :  { %562 = vmatpush1.msra.mxu1 %v531_v5  ;;  %v518_v27 = vpop.permute.xlu1 %517 }
 0x10c   :  { %v514_v10 = vpop.permute.xlu0 %513  ;;  %v281_v13 = vadd.f32 %v277_v24, %v255_v21  ;;  %v280_v4 = vadd.f32 %v276_v1, %v254_v6 }
 0x10d   :  { %v521_v17 = vsel %vm266_vm7, %v514_v10, %v518_v27  ;;  %v523_v37 = vsel %vm266_vm7, %v518_v27, %v514_v10 }
 0x10e   :  { %v525_v22 = vmul.f32 %v521_v17, %v272_v60  ;;  %v526_v53 = vmul.f32 %v523_v37, %v273_v3  ;;  %323 = vmatprep.subr.mxu0 %v281_v13  ;;  %v1326_v3 = vmov 5   ;;  %v1328_v17 = vmov 7  }
 0x10f   :  { %324 = vmatpush1.msra.mxu0 %v280_v4  ;;  %1222 = vset.pattern.permute.xlu1 %v1326_v3 }
 0x110   :  { %1174 = vmatmul.mubr.msk.f32.vlgmr.msra.gmra.mxu0 %vm289_vm8, %v57_v29  ;;  %v530_v55 = vadd.f32 %v526_v53, %v510_v15  ;;  %v529_v18 = vadd.f32 %v525_v22, %v509_v56  ;;  %1188 = vmatprep.subr.mxu0 %v1323_v12  ;;  %v58_v22 = vld [vmem:[%s1869_s3] sm:$0x3] }
 0x111   :  { %1190 = vmatprep.mubr.msk.f32.mxu0 %vm1327_vm9, %v1323_v12 }
 0x112   :  { %563 = vmatprep.subr.mxu1 %v530_v55  ;;  %v1329_v55 = vmov 6  }
 0x113   :  { %564 = vmatpush1.msra.mxu1 %v529_v18 }
 0x114   :  { %1175 = vmatmul.mubr.msk.f32.vlgmr.msra.gmra.mxu1 %vm289_vm8, %v57_v29  ;;  %1193 = vmatprep.subr.mxu1 %v1323_v12 }
 0x115   :  { %1195 = vmatprep.mubr.msk.f32.mxu1 %vm1327_vm9, %v1323_v12 }
 0x119   :  { %v287_v9 = vpop.permute.xlu0 %286 }
 0x1d0   :  { %v359_v0 = vpop.f32.mrf.mxu0 }
 0x1d1   :  { %v360_v43 = vadd.f32 %v359_v0, %v287_v9 }
 0x1d2   :  { %v361_v44 = vpop.f32.mrf.mxu0 }
 0x1d3   :  { %v362_v40 = vadd.f32 %v361_v44, %v287_v9 }
 0x1d4   :  { %v599_v30 = vpop.f32.mrf.mxu1 }
 0x1d5   :  { %v604_v31 = vadd.f32 %v362_v40, %v360_v43  ;;  %v600_v33 = vadd.f32 %v599_v30, %v287_v9  ;;  %v1330_v30 = vmov 0  }
 0x1d6   :  { %v601_v47 = vpop.f32.mrf.mxu1 }
 0x1d7   :  { %v602_v34 = vadd.f32 %v601_v47, %v287_v9  ;;  %605 = vadd.xlane.f32.xlu1 %v604_v31  ;;  %v1331_v31 = vmov 1  }
 0x1d9   :  { %v608_v35 = vadd.f32 %v602_v34, %v600_v33 }
 0x1db   :  { %609 = vadd.xlane.f32.xlu0 %v608_v35 }
 0x260   :  { %v606_v38 = vpop.xlane.xlu1 %605 }
 0x264   :  { %v610_v25 = vpop.xlane.xlu0 %609 }
 0x265   :  { %v611_v26 = vadd.f32 %v610_v25, %v606_v38 }
 0x267   :  { %v612_v48 = vmul.f32 0.001953125, %v611_v26 }
 0x269   :  { %v621_v51 = vsub.f32 %v600_v33, %v612_v48  ;;  %v622_v2 = vsub.f32 %v602_v34, %v612_v48  ;;  %v613_v19 = vsub.f32 %v360_v43, %v612_v48  ;;  %v614_v20 = vsub.f32 %v362_v40, %v612_v48 }
 0x26b   :  { %v623_v39 = vmul.f32 %v621_v51, %v621_v51  ;;  %v624_v52 = vmul.f32 %v622_v2, %v622_v2  ;;  %v615_v28 = vmul.f32 %v613_v19, %v613_v19  ;;  %v616_v54 = vmul.f32 %v614_v20, %v614_v20  ;;  %v1793_v51 = vld [vmem:[%s1872_s6 + $0x8] sm:$0xff] }
 0x26d   :  { %v625_v42 = vadd.f32 %v624_v52, %v623_v39  ;;  %v617_v58 = vadd.f32 %v616_v54, %v615_v28  ;;  %v60_v54 = vld [vmem:[%s1871_s5] sm:$0xff] }
 0x26f   :  { %626 = vadd.xlane.f32.xlu0 %v625_v42  ;;  %618 = vadd.xlane.f32.xlu1 %v617_v58  ;;  %v61_v42 = vld [vmem:[%s1871_s5 + $0x8] sm:$0xff] }
 0x2f8   :  { %v627_v49 = vpop.xlane.xlu0 %626  ;;  %v619_v50 = vpop.xlane.xlu1 %618 }
 0x2f9   :  { %v628_v59 = vadd.f32 %v627_v49, %v619_v50 }
 0x2fb   :  { %v629_v63 = vmul.f32 0.001953125, %v628_v59 }
 0x2fd   :  { %v630_v60 = vadd.f32 1e-05, %v629_v63 }
 0x2ff   :  { %1231 = vrsqrt.f32 %v630_v60 }
 0x30c   :  { %v1232_v8 = vpop.eup %1231 }
 0x30d   :  { %v632_v5 = vmul.f32 %v1232_v8, %v1525_v32 }
 0x30f   :  { %641 = vperm.xlu0 %1221, %v632_v5   ;;  %v633_v14 = vmul.f32 %v632_v5, %v612_v48 }
 0x311   :  { %635 = vrot.lane.b32.xlu1 %v633_v14, %s1318_s13 }
 0x313   :  { %1225 = vset.pattern.permute.xlu0 %v1330_v30 }
 0x383   :  { %v636_v41 = vpop.permute.xlu1 %635 }
 0x384   :  { %v638_v57 = vsub.f32 %v1525_v32, %v636_v41 }
 0x386   :  { %648 = vperm.xlu1 %1222, %v638_v57  }
 0x38a   :  { %v642_v7 = vpop.permute.xlu0 %641  ;;  %1223 = vset.pattern.permute.xlu1 %v1328_v17 }
 0x38b   :  { %v644_v16 = vmul.f32 %v642_v7, %v360_v43  ;;  %v645_v6 = vmul.f32 %v642_v7, %v362_v40  ;;  %v655_v21 = vmul.f32 %v642_v7, %v600_v33  ;;  %v656_v45 = vmul.f32 %v642_v7, %v602_v34  ;;  %v59_v40 = vld [vmem:[%s1870_s4] sm:$0xff] }
 0x401   :  { %v649_v46 = vpop.permute.xlu1 %648 }
 0x402   :  { %v1760_v23 = vadd.f32 %v649_v46, %v644_v16  ;;  %v1762_v61 = vadd.f32 %v649_v46, %v645_v6  ;;  %v1764_v1 = vadd.f32 %v655_v21, %v649_v46  ;;  %v1766_v24 = vadd.f32 %v656_v45, %v649_v46 }
 0x404   :  { %v653_v27 = vmax.f32 %v1760_v23, 0.0  ;;  %v654_v36 = vmax.f32 %v1762_v61, 0.0  ;;  %v659_v11 = vmax.f32 %v1764_v1, 0.0  ;;  %v660_v10 = vmax.f32 %v1766_v24, 0.0 }
 0x406   :  { %v661_v13 = vadd.f32 %v654_v36, %v653_v27  ;;  %v666_v4 = vadd.f32 %v660_v10, %v659_v11 }
 0x408   :  { %662 = vadd.xlane.f32.xlu1 %v661_v13  ;;  %667 = vadd.xlane.f32.xlu0 %v666_v4 }
 0x419   :  { %673 = vperm.xlu1 %1223, %v1525_v32  }
 0x41d   :  { %1224 = vset.pattern.permute.xlu1 %v1329_v55 }
 0x41e   :  { %752 = vperm.xlu1 %1224, %v1525_v32  }
 0x422   :  { %1226 = vset.pattern.permute.xlu1 %v1331_v31 }
 0x491   :  { %v663_v37 = vpop.xlane.xlu1 %662  ;;  %v668_v29 = vpop.xlane.xlu0 %667 }
 0x492   :  { %v665_v56 = vmul.f32 0.00390625, %v663_v37  ;;  %v669_v15 = vmul.f32 0.00390625, %v668_v29 }
 0x494   :  { %v671_v53 = vsel %vm670_vm10, %v665_v56, %v669_v15 }
 0x495   :  { %1189 = vmatpush3.msra.mxu0 %v671_v53  ;;  %v674_v18 = vpop.permute.xlu1 %673 }
 0x496   :  { %1191 = vmatmul.mubr.msk.f32.vlgmr.msra.gmra.mxu0 %vm676_vm11, %v58_v22 }
 0x497   :  { %925 = vmatprep.mubr.f32.mxu0 %v1323_v12 }
 0x499   :  { %v753_v47 = vpop.permute.xlu1 %752 }
 0x556   :  { %v746_v9 = vpop.f32.mrf.mxu0 }
 0x557   :  { %v747_v0 = vadd.f32 %v746_v9, %v674_v18 }
 0x558   :  { %v1192_v43 = vpop.f32.mrf.mxu0 }
 0x559   :  { %v750_v44 = vmax.f32 %v747_v0, 0.0 }
 0x55b   :  { %1194 = vmatpush3.msk.msra.mxu1 %vm759_vm12, %v750_v44 }
 0x55c   :  { %1196 = vmatmul.mubr.msk.f32.vlgmr.msra.gmra.mxu1 %vm755_vm13, %v59_v40 }
 0x55d   :  { %1008 = vmatprep.mubr.f32.mxu1 %v1323_v12 }
 0x61c   :  { %v829_v33 = vpop.f32.mrf.mxu1 }
 0x61d   :  { %v830_v34 = vadd.f32 %v829_v33, %v753_v47 }
 0x61e   :  { %v1197_v35 = vpop.f32.mrf.mxu1 }
 0x61f   :  { %v1179_v38 = vmul.f32 -1.442695, %v830_v34 }
 0x621   :  { %1233 = vpow2.f32 %v1179_v38 }
 0x62e   :  { %v1234_v25 = vpop.eup %1233 }
 0x62f   :  { %v836_v26 = vadd.f32 1.0, %v1234_v25 }
 0x631   :  { %1235 = vrcp.f32 %v836_v26 }
 0x63e   :  { %v1236_v48 = vpop.eup %1235 }
 0x63f   :  { %939 = vperm.xlu1 %1226, %v1236_v48   ;;  %841 = vperm.xlu0 %1225, %v1236_v48  }
 0x643   :  { %1227 = vset.pattern.permute.xlu1 %v1330_v30 }
 0x644   :  { %847 = vperm.xlu1 %1227, %v1525_v32  }
 0x648   :  { %852 = vperm.xlu1 %1227, %v1793_v51  }
 0x64c   :  { %1228 = vset.pattern.permute.xlu1 %v1331_v31 }
 0x6ba   :  { %v940_v2 = vpop.permute.xlu1 %939  ;;  %v842_v19 = vpop.permute.xlu0 %841 }
 0x6bb   :  { %v942_v20 = vmul.f32 %v940_v2, %v659_v11  ;;  %v943_v39 = vmul.f32 %v940_v2, %v660_v10  ;;  %v844_v52 = vmul.f32 %v842_v19, %v653_v27  ;;  %v845_v28 = vmul.f32 %v842_v19, %v654_v36 }
 0x6bd   :  { %891 = vmatprep.subr.mxu0 %v845_v28  ;;  %974 = vmatprep.subr.mxu1 %v943_v39 }
 0x6be   :  { %892 = vmatpush1.msra.mxu0 %v844_v52  ;;  %975 = vmatpush1.msra.mxu1 %v942_v20 }
 0x6bf   :  { %1180 = vmatmul.mubr.msk.f32.vlgmr.msra.gmra.mxu0 %vm676_vm11, %v60_v54  ;;  %1182 = vmatmul.mubr.msk.f32.vlgmr.msra.gmra.mxu1 %vm676_vm11, %v60_v54  ;;  %v848_v58 = vpop.permute.xlu1 %847  ;;  %v1332_v54 = vmov 2  }
 0x6c0   :  { %931 = vmatprep.mubr.f32.mxu0 %v1323_v12  ;;  %1014 = vmatprep.mubr.f32.mxu1 %v1323_v12 }
 0x6c1   :  { %1229 = vset.pattern.permute.xlu0 %v1332_v54 }
 0x6c3   :  { %1181 = vmatmul.mubr.msk.f32.gmra.mxu0 %vm676_vm11, %v61_v42  ;;  %1183 = vmatmul.mubr.msk.f32.gmra.mxu1 %vm676_vm11, %v61_v42  ;;  %v853_v14 = vpop.permute.xlu1 %852 }
 0x77f   :  { %v927_v62 = vpop.f32.mrf.mxu0  ;;  %v1010_v49 = vpop.f32.mrf.mxu1 }
 0x780   :  { %v1812_v63 = vadd.f32 %v927_v62, %v848_v58  ;;  %v1816_v12 = vadd.f32 %v1010_v49, %v848_v58 }
 0x781   :  { %v929_v50 = vpop.f32.mrf.mxu0  ;;  %v1012_v59 = vpop.f32.mrf.mxu1 }
 0x782   :  { %v1814_v60 = vadd.f32 %v929_v50, %v848_v58  ;;  %v1818_v5 = vadd.f32 %v1012_v59, %v848_v58 }
 0x783   :  { %v933_v3 = vpop.f32.mrf.mxu0  ;;  %v1016_v8 = vpop.f32.mrf.mxu1 }
 0x784   :  { %v1021_v41 = vadd.f32 %v1814_v60, %v1812_v63  ;;  %v1822_v16 = vadd.f32 %v933_v3, %v853_v14  ;;  %v1029_v46 = vadd.f32 %v1818_v5, %v1816_v12  ;;  %v1832_v23 = vadd.f32 %v1016_v8, %v853_v14  ;;  %v1241_v8 = vld [vmem:[%s1872_s6] sm:$0xff]  ;;  %s1333_s6 = smov [#allocation7]  }
 0x785   :  { %v935_v57 = vpop.f32.mrf.mxu0  ;;  %v1018_v7 = vpop.f32.mrf.mxu1  ;;  %s1161_s9 = sshll.u32 %s1333_s6, 4  ;;  %s1162_s9 = int_to_ptr.vmem [resolvable:$true] %s1161_s9 }
 0x786   :  { %v1824_v6 = vadd.f32 %v935_v57, %v853_v14  ;;  %1022 = vadd.xlane.f32.xlu1 %v1021_v41  ;;  %v1826_v21 = vadd.f32 %v1018_v7, %v853_v14  ;;  %s1286_s10 = scalar_lea.vmem %s1162_s9, 1024  ;;  %p1291_p11 = scmp.lt.s32.totalorder %s1162_s9, %s1162_s9 }
 0x787   :  { %p1287_p10 = scmp.ne.s32.totalorder %s1162_s9, %s1286_s10  ;;  %p1292_p12 = scmp.lt.s32.totalorder %s1286_s10, %s1286_s10 }
 0x788   :  { %v1024_v45 = vadd.f32 %v1824_v6, %v1822_v16  ;;  %v1032_v61 = vadd.f32 %v1826_v21, %v1832_v23 }
 0x789   :  { %p1293_p13 = por %p1292_p12, %p1291_p11 }
 0x78a   :  { %1025 = vadd.xlane.f32.xlu0 %v1024_v45  ;;  %1030 = vadd.xlane.f32.xlu1 %v1029_v46 }
 0x78b   :  { %p1294_p0 = pnand %p1293_p13, %p1287_p10 }
 0x78e   :  { %1033 = vadd.xlane.f32.xlu1 %v1032_v61 }
 0x80f   :  { %v1023_v1 = vpop.xlane.xlu1 %1022 }
 0x813   :  { %v1031_v24 = vpop.xlane.xlu1 %1030  ;;  %v1026_v11 = vpop.xlane.xlu0 %1025 }
 0x814   :  { %v1035_v27 = vadd.f32 %v1031_v24, %v1023_v1  ;;  %v1139_v1 = vld [vmem:[#allocation2 + $0x20] sm:$0xff]  ;;  %v1140_v24 = vld [vmem:[#allocation2 + $0x28] sm:$0xff] }
 0x816   :  { %v1037_v36 = vmul.f32 0.001953125, %v1035_v27 }
 0x817   :  { %v1034_v10 = vpop.xlane.xlu1 %1033 }
 0x818   :  { %v1036_v13 = vadd.f32 %v1034_v10, %v1026_v11  ;;  %v1039_v4 = vsub.f32 %v1812_v63, %v1037_v36  ;;  %v1040_v17 = vsub.f32 %v1814_v60, %v1037_v36  ;;  %v1055_v37 = vsub.f32 %v1816_v12, %v1037_v36 }
 0x819   :  { %v1056_v29 = vsub.f32 %v1818_v5, %v1037_v36 }
 0x81a   :  { %v1038_v56 = vmul.f32 0.001953125, %v1036_v13  ;;  %v1043_v15 = vmul.f32 %v1039_v4, %v1039_v4  ;;  %v1044_v22 = vmul.f32 %v1040_v17, %v1040_v17  ;;  %v1059_v53 = vmul.f32 %v1055_v37, %v1055_v37  ;;  %v1242_v4 = vld [vmem:[#allocation2] sm:$0xff] }
 0x81b   :  { %v1060_v18 = vmul.f32 %v1056_v29, %v1056_v29 }
 0x81c   :  { %v1047_v55 = vadd.f32 %v1044_v22, %v1043_v15  ;;  %v1041_v9 = vsub.f32 %v1822_v16, %v1038_v56  ;;  %v1042_v0 = vsub.f32 %v1824_v6, %v1038_v56  ;;  %v1057_v43 = vsub.f32 %v1832_v23, %v1038_v56 }
 0x81d   :  { %v1063_v44 = vadd.f32 %v1060_v18, %v1059_v53  ;;  %v1058_v31 = vsub.f32 %v1826_v21, %v1038_v56 }
 0x81e   :  { %1048 = vadd.xlane.f32.xlu1 %v1047_v55  ;;  %v1045_v40 = vmul.f32 %v1041_v9, %v1041_v9  ;;  %v1046_v30 = vmul.f32 %v1042_v0, %v1042_v0  ;;  %v1061_v33 = vmul.f32 %v1057_v43, %v1057_v43  ;;  %v1141_v9 = vld [vmem:[#allocation2 + $0x30] sm:$0xff]  ;;  %v1142_v0 = vld [vmem:[#allocation2 + $0x38] sm:$0xff] }
 0x81f   :  { %v1062_v34 = vmul.f32 %v1058_v31, %v1058_v31 }
 0x820   :  { %v1050_v47 = vadd.f32 %v1046_v30, %v1045_v40 }
 0x821   :  { %v1066_v35 = vadd.f32 %v1062_v34, %v1061_v33  ;;  %v1245_v34 = vld [vmem:[#allocation2 + $0x18] sm:$0xff] }
 0x822   :  { %1064 = vadd.xlane.f32.xlu1 %v1063_v44 }
 0x826   :  { %1051 = vadd.xlane.f32.xlu1 %v1050_v47  ;;  %v1244_v47 = vld [vmem:[#allocation2 + $0x10] sm:$0xff] }
 0x82a   :  { %1067 = vadd.xlane.f32.xlu1 %v1066_v35 }
 0x8a7   :  { %v1049_v38 = vpop.xlane.xlu1 %1048 }
 0x8ab   :  { %v1065_v25 = vpop.xlane.xlu1 %1064 }
 0x8ac   :  { %v1069_v26 = vadd.f32 %v1065_v25, %v1049_v38 }
 0x8ae   :  { %v1071_v48 = vmul.f32 0.001953125, %v1069_v26 }
 0x8af   :  { %v1052_v2 = vpop.xlane.xlu1 %1051 }
 0x8b0   :  { %v1073_v19 = vadd.f32 1e-05, %v1071_v48 }
 0x8b2   :  { %1237 = vrsqrt.f32 %v1073_v19 }
 0x8b3   :  { %v1068_v20 = vpop.xlane.xlu1 %1067 }
 0x8b4   :  { %v1070_v39 = vadd.f32 %v1068_v20, %v1052_v2 }
 0x8b6   :  { %v1072_v52 = vmul.f32 0.001953125, %v1070_v39 }
 0x8b8   :  { %v1074_v28 = vadd.f32 1e-05, %v1072_v52 }
 0x8ba   :  { %1239 = vrsqrt.f32 %v1074_v28 }
 0x8bf   :  { %v1238_v42 = vpop.eup %1237 }
 0x8c0   :  { %v1077_v58 = vmul.f32 %v1238_v42, %v1525_v32 }
 0x8c2   :  { %v1079_v62 = vmul.f32 %v1077_v58, %v1037_v36 }
 0x8c4   :  { %1083 = vrot.lane.b32.xlu1 %v1079_v62, %s1318_s13 }
 0x8c7   :  { %v1240_v49 = vpop.eup %1239 }
 0x8c8   :  { %1093 = vperm.xlu1 %1228, %v1077_v58   ;;  %v1078_v50 = vmul.f32 %v1240_v49, %v1793_v51 }
 0x8ca   :  { %v1080_v59 = vmul.f32 %v1078_v50, %v1038_v56 }
 0x8cc   :  { %1098 = vperm.xlu1 %1228, %v1078_v50   ;;  %1085 = vrot.lane.b32.xlu0 %v1080_v59, %s1318_s13 }
 0x8d0   :  { %1230 = vset.pattern.permute.xlu1 %v1332_v54 }
 0x936   :  { %v1084_v3 = vpop.permute.xlu1 %1083 }
 0x937   :  { %v1089_v14 = vsub.f32 %v1241_v8, %v1084_v3 }
 0x939   :  { %1107 = vperm.xlu0 %1229, %v1089_v14  }
 0x93e   :  { %v1086_v32 = vpop.permute.xlu0 %1085 }
 0x93f   :  { %v1090_v41 = vsub.f32 %v1793_v51, %v1086_v32  ;;  %v1243_v51 = vld [vmem:[#allocation2 + $0x8] sm:$0xff] }
 0x941   :  { %1112 = vperm.xlu1 %1230, %v1090_v41  }
 0x943   :  { %v1094_v57 = vpop.permute.xlu1 %1093 }
 0x944   :  { %v1101_v7 = vmul.f32 %v1094_v57, %v1812_v63  ;;  %v1102_v45 = vmul.f32 %v1094_v57, %v1814_v60  ;;  %v1131_v46 = vmul.f32 %v1094_v57, %v1816_v12  ;;  %v1132_v61 = vmul.f32 %v1094_v57, %v1818_v5 }
 0x947   :  { %v1099_v63 = vpop.permute.xlu1 %1098 }
 0x948   :  { %v1103_v5 = vmul.f32 %v1099_v63, %v1822_v16  ;;  %v1104_v53 = vmul.f32 %v1099_v63, %v1824_v6  ;;  %v1133_v55 = vmul.f32 %v1099_v63, %v1832_v23  ;;  %v1134_v18 = vmul.f32 %v1099_v63, %v1826_v21 }
 0x9b4   :  { %v1108_v27 = vpop.permute.xlu0 %1107 }
 0x9b5   :  { %v1115_v36 = vadd.f32 %v1108_v27, %v1101_v7  ;;  %v1116_v11 = vadd.f32 %v1108_v27, %v1102_v45  ;;  %v1135_v10 = vadd.f32 %v1131_v46, %v1108_v27  ;;  %v1136_v13 = vadd.f32 %v1132_v61, %v1108_v27 }
 0x9b7   :  { %v1119_v17 = vadd.f32 %v1242_v4, %v1115_v36  ;;  %v1120_v37 = vadd.f32 %v1243_v51, %v1116_v11  ;;  %v1143_v29 = vadd.f32 %v1139_v1, %v1135_v10  ;;  %v1144_v56 = vadd.f32 %v1140_v24, %v1136_v13 }
 0x9b9   :  { %v1123_v15 = vmax.f32 %v1119_v17, 0.0  ;;  %v1124_v60 = vmax.f32 %v1120_v37, 0.0  ;;  %v1147_v22 = vmax.f32 %v1143_v29, 0.0  ;;  %v1148_v12 = vmax.f32 %v1144_v56, 0.0 }
 0x9bb   :  { %1127 = vst [vmem:[#allocation7] sm:$0xff] %v1123_v15  ;;  %1128 = vst [vmem:[#allocation7 + $0x8] sm:$0xff] %v1124_v60 }
 0x9bc   :  { %1152 = vst [vmem:[#allocation7 + $0x20] sm:$0xff] %v1147_v22  ;;  %1153 = vst [vmem:[#allocation7 + $0x28] sm:$0xff] %v1148_v12  ;;  %v1113_v43 = vpop.permute.xlu1 %1112 }
 0x9bd   :  { %v1117_v44 = vadd.f32 %v1113_v43, %v1103_v5  ;;  %v1118_v40 = vadd.f32 %v1113_v43, %v1104_v53  ;;  %v1137_v30 = vadd.f32 %v1133_v55, %v1113_v43  ;;  %v1138_v31 = vadd.f32 %v1134_v18, %v1113_v43 }
 0x9bf   :  { %v1121_v33 = vadd.f32 %v1244_v47, %v1117_v44  ;;  %v1122_v35 = vadd.f32 %v1245_v34, %v1118_v40  ;;  %v1145_v16 = vadd.f32 %v1141_v9, %v1137_v30  ;;  %v1146_v38 = vadd.f32 %v1142_v0, %v1138_v31 }
 0x9c1   :  { %v1125_v6 = vmax.f32 %v1121_v33, 0.0  ;;  %v1126_v25 = vmax.f32 %v1122_v35, 0.0  ;;  %v1149_v23 = vmax.f32 %v1145_v16, 0.0  ;;  %v1150_v26 = vmax.f32 %v1146_v38, 0.0 }
 0x9c3   :  { %1129 = vst [vmem:[#allocation7 + $0x10] sm:$0xff] %v1125_v6  ;;  %1130 = vst [vmem:[#allocation7 + $0x18] sm:$0xff] %v1126_v25 }
 0x9c4   :  { %1154 = vst [vmem:[#allocation7 + $0x30] sm:$0xff] %v1149_v23  ;;  %1155 = vst [vmem:[#allocation7 + $0x38] sm:$0xff] %v1150_v26 }
 0x9c5   :  { %1297 = shalt.err (!%p1294_p0)
}
 0x9c6   :  { %1167 = dma.vmem_to_hbm [thread:$0]  %s1162_s9, 1024, %s1873_s7, [#allocation4], %s1313_s27, %s1313_s27, %s1314_s28  }
 0x9c7   :  { %1310 = dma.done.wait [#allocation4], 1024  }
 0x9c8   :  { %1311 = vsyncadd [#allocation4], 4294966272 }
 0x9c9   :  { %1171 = vsyncpa [#allocation3], 1 }
 0x9ca   :  { %1172 = vsyncpa [#allocation6], 1 }
 0x9cb   :  { %1173 = vsyncpa [#allocation4], 1 }

</bundles_post_ra>
